<compile_context>
chip_gen: v5e
topology: v5e:2x2
jax: 0.10.0
libtpu: 0.0.40
codegen_flags: <defaults>
</compile_context>

<pallas_src>
import functools

import jax
import jax.numpy as jnp
from jax.experimental import pallas as pl
from jax.experimental.pallas import tpu as pltpu


VMEM_LIMIT = 32 * 1024 * 1024  # fits v5e/v6e/v7x scoped VMEM comfortably


# ----------------------------- tiling helpers -----------------------------

def _pick_tile(dim, candidates=(1024, 512, 256, 128), min_steps=1):
    """Largest candidate that divides dim (and yields >= min_steps grid steps).

    Falls back to the full dim as a single block only when dim is small; large
    non-tileable dims raise instead of silently blowing the VMEM budget.
    """
    for c in candidates:
        if c <= dim and dim % c == 0 and dim // c >= min_steps:
            return c
    if dim > candidates[0]:
        # TODO(synk): pad rows to a multiple of 128 in the wrapper instead.
        raise ValueError(
            f"dimension {dim} is not tileable by {candidates}; pad it to a "
            f"multiple of 128 before calling the Pallas kernels")
    return dim


def _gelu(y):
    # Sigmoid-approximate GELU (1 EUP exp + a few VPU ops).
    # TODO(synk): torch BERT uses exact erf-GELU; erf has no guaranteed Mosaic
    # lowering, so we use the cheap sigmoid approximation (review suggestion).
    return y * (1.0 / (1.0 + jnp.exp(-1.702 * y)))


# ----------------------------- Pallas kernels -----------------------------

def _linear_kernel(x_ref, w_ref, b_ref, o_ref, acc_ref):
    """Tiled o = x @ w + b, fp32 accumulation over the K grid axis."""
    @pl.when(pl.program_id(2) == 0)
    def _():
        acc_ref[...] = jnp.zeros_like(acc_ref)

    acc_ref[...] += jnp.dot(x_ref[...], w_ref[...],
                            preferred_element_type=jnp.float32)

    @pl.when(pl.program_id(2) == pl.num_programs(2) - 1)
    def _():
        o_ref[...] = (acc_ref[...] + b_ref[...]).astype(o_ref.dtype)


def linear(x, w, b, out_dtype=jnp.bfloat16):
    M, K = x.shape
    N = w.shape[1]
    tm = _pick_tile(M)
    tn = _pick_tile(N)
    tk = _pick_tile(K, (512, 256, 128))
    return pl.pallas_call(
        _linear_kernel,
        out_shape=jax.ShapeDtypeStruct((M, N), out_dtype),
        grid_spec=pltpu.PrefetchScalarGridSpec(
            num_scalar_prefetch=0,
            grid=(M // tm, N // tn, K // tk),
            in_specs=[
                pl.BlockSpec((tm, tk), lambda i, j, k: (i, k)),
                pl.BlockSpec((tk, tn), lambda i, j, k: (k, j)),
                pl.BlockSpec((1, tn), lambda i, j, k: (0, j)),
            ],
            out_specs=pl.BlockSpec((tm, tn), lambda i, j, k: (i, j)),
            scratch_shapes=[pltpu.VMEM((tm, tn), jnp.float32)],
        ),
        compiler_params=pltpu.CompilerParams(
            dimension_semantics=("parallel", "parallel", "arbitrary"),
            vmem_limit_bytes=VMEM_LIMIT),
    )(x.astype(jnp.bfloat16), w, b)


def _linear_add_ln_kernel(x_ref, w_ref, b_ref, r_ref, g_ref, bt_ref,
                          o_ref, acc_ref, *, eps):
    """o = LayerNorm(x @ w + b + residual); LN over the full (resident) N axis."""
    @pl.when(pl.program_id(1) == 0)
    def _():
        acc_ref[...] = jnp.zeros_like(acc_ref)

    acc_ref[...] += jnp.dot(x_ref[...], w_ref[...],
                            preferred_element_type=jnp.float32)

    @pl.when(pl.program_id(1) == pl.num_programs(1) - 1)
    def _():
        y = acc_ref[...] + b_ref[...] + r_ref[...].astype(jnp.float32)
        mu = jnp.mean(y, axis=-1, keepdims=True)
        var = jnp.mean((y - mu) ** 2, axis=-1, keepdims=True)
        yn = (y - mu) * jax.lax.rsqrt(var + eps)
        o_ref[...] = (yn * g_ref[...] + bt_ref[...]).astype(o_ref.dtype)


def linear_add_ln(x, w, b, residual, gamma, beta, eps=1e-12,
                  out_dtype=jnp.bfloat16):
    M, K = x.shape
    N = w.shape[1]
    tm = _pick_tile(M, (512, 256, 128), min_steps=2)   # keep >=2 steps for megacore
    tk = _pick_tile(K, (512, 256, 128))
    return pl.pallas_call(
        functools.partial(_linear_add_ln_kernel, eps=eps),
        out_shape=jax.ShapeDtypeStruct((M, N), out_dtype),
        grid_spec=pltpu.PrefetchScalarGridSpec(
            num_scalar_prefetch=0,
            grid=(M // tm, K // tk),
            in_specs=[
                pl.BlockSpec((tm, tk), lambda i, k: (i, k)),
                pl.BlockSpec((tk, N), lambda i, k: (k, 0)),
                pl.BlockSpec((1, N), lambda i, k: (0, 0)),
                pl.BlockSpec((tm, N), lambda i, k: (i, 0)),
                pl.BlockSpec((1, N), lambda i, k: (0, 0)),
                pl.BlockSpec((1, N), lambda i, k: (0, 0)),
            ],
            out_specs=pl.BlockSpec((tm, N), lambda i, k: (i, 0)),
            scratch_shapes=[pltpu.VMEM((tm, N), jnp.float32)],
        ),
        compiler_params=pltpu.CompilerParams(
            dimension_semantics=("parallel", "arbitrary"),
            vmem_limit_bytes=VMEM_LIMIT),
    )(x.astype(jnp.bfloat16), w, b, residual.astype(jnp.bfloat16), gamma, beta)


def _ffn_kernel(x_ref, iw_ref, ib_ref, ow_ref, ob_ref, g_ref, bt_ref,
                o_ref, *, eps):
    """Fused FFN block: LayerNorm(GELU(x@Wi+bi)@Wo+bo + x).

    The (tm, I) GELU intermediate stays in VMEM; no HBM round-trip.
    """
    x = x_ref[...]                                                  # (tm, H) bf16
    y = jnp.dot(x, iw_ref[...], preferred_element_type=jnp.float32) + ib_ref[...]
    y = _gelu(y)
    y2 = (jnp.dot(y.astype(jnp.bfloat16), ow_ref[...],
                  preferred_element_type=jnp.float32)
          + ob_ref[...] + x.astype(jnp.float32))
    mu = jnp.mean(y2, axis=-1, keepdims=True)
    var = jnp.mean((y2 - mu) ** 2, axis=-1, keepdims=True)
    yn = (y2 - mu) * jax.lax.rsqrt(var + eps)
    o_ref[...] = (yn * g_ref[...] + bt_ref[...]).astype(o_ref.dtype)


def ffn_block(x, i_w, i_b, o_w, o_b, gamma, beta, eps=1e-12,
              out_dtype=jnp.bfloat16):
    M, H = x.shape
    I = i_w.shape[1]
    # tm capped at 512 so the (tm, I) fp32 intermediate stays ~6 MB at BERT sizes.
    tm = _pick_tile(M, (512, 256, 128), min_steps=2)
    return pl.pallas_call(
        functools.partial(_ffn_kernel, eps=eps),
        out_shape=jax.ShapeDtypeStruct((M, H), out_dtype),
        grid=(M // tm,),
        in_specs=[
            pl.BlockSpec((tm, H), lambda i: (i, 0)),
            pl.BlockSpec((H, I), lambda i: (0, 0)),
            pl.BlockSpec((1, I), lambda i: (0, 0)),
            pl.BlockSpec((I, H), lambda i: (0, 0)),
            pl.BlockSpec((1, H), lambda i: (0, 0)),
            pl.BlockSpec((1, H), lambda i: (0, 0)),
            pl.BlockSpec((1, H), lambda i: (0, 0)),
        ],
        out_specs=pl.BlockSpec((tm, H), lambda i: (i, 0)),
        compiler_params=pltpu.CompilerParams(
            dimension_semantics=("parallel",),
            vmem_limit_bytes=VMEM_LIMIT),
    )(x.astype(jnp.bfloat16), i_w, i_b, o_w, o_b, gamma, beta)


def _ln_kernel(x_ref, g_ref, b_ref, o_ref, *, eps):
    """Row-tiled LayerNorm (no residual) with fp32 statistics."""
    x = x_ref[...].astype(jnp.float32)
    mu = jnp.mean(x, axis=-1, keepdims=True)
    var = jnp.mean((x - mu) ** 2, axis=-1, keepdims=True)
    y = (x - mu) * jax.lax.rsqrt(var + eps)
    o_ref[...] = (y * g_ref[...] + b_ref[...]).astype(o_ref.dtype)


def layer_norm(x, gamma, beta, eps=1e-12, out_dtype=jnp.bfloat16):
    M, N = x.shape
    tm = _pick_tile(M, (512, 256, 128), min_steps=2)
    return pl.pallas_call(
        functools.partial(_ln_kernel, eps=eps),
        out_shape=jax.ShapeDtypeStruct((M, N), out_dtype),
        grid=(M // tm,),
        in_specs=[
            pl.BlockSpec((tm, N), lambda i: (i, 0)),
            pl.BlockSpec((1, N), lambda i: (0, 0)),
            pl.BlockSpec((1, N), lambda i: (0, 0)),
        ],
        out_specs=pl.BlockSpec((tm, N), lambda i: (i, 0)),
        compiler_params=pltpu.CompilerParams(
            dimension_semantics=("parallel",)),
    )(x, gamma, beta)


def _attention_kernel(qkv_ref, bias_ref, o_ref, *, n_heads, head_dim, hidden):
    """Per-batch attention on packed QKV rows: softmax(q k^T + key_bias) v.

    qkv_ref is (S, 3H) bf16 (Q | K | V packed along lanes); o_ref is (S, H).
    The 1/sqrt(Dh) scale is folded into the Q projection weights, so no scale
    multiply on the (S, S) score tile.
    """
    bias = bias_ref[...]                                            # (1, S) fp32
    # TODO(synk): static per-head unroll + full (S, S) scores; switch to a
    # flash-style online-softmax with a KV grid axis for S >= 1024.
    for h in range(n_heads):
        q = qkv_ref[:, h * head_dim:(h + 1) * head_dim]             # (S, Dh)
        k = qkv_ref[:, hidden + h * head_dim:hidden + (h + 1) * head_dim]
        v = qkv_ref[:, 2 * hidden + h * head_dim:2 * hidden + (h + 1) * head_dim]
        s = jax.lax.dot_general(q, k, (((1,), (1,)), ((), ())),
                                preferred_element_type=jnp.float32)  # (S, S)
        s = s + bias                                                # key-mask bias
        s = s - jnp.max(s, axis=-1, keepdims=True)
        p = jnp.exp(s)
        p = p * pl.reciprocal(jnp.sum(p, axis=-1, keepdims=True), approx=True)
        o_ref[:, h * head_dim:(h + 1) * head_dim] = jnp.dot(
            p.astype(jnp.bfloat16), v,
            preferred_element_type=jnp.float32).astype(o_ref.dtype)


def attention(qkv, bias, *, n_heads, head_dim, hidden):
    B, S, three_h = qkv.shape
    return pl.pallas_call(
        functools.partial(_attention_kernel, n_heads=n_heads,
                          head_dim=head_dim, hidden=hidden),
        out_shape=jax.ShapeDtypeStruct((B, S, hidden), jnp.bfloat16),
        grid=(B,),
        in_specs=[
            pl.BlockSpec((None, S, three_h), lambda b: (b, 0, 0)),
            pl.BlockSpec((None, 1, S), lambda b: (b, 0, 0)),
        ],
        out_specs=pl.BlockSpec((None, S, hidden), lambda b: (b, 0, 0)),
        compiler_params=pltpu.CompilerParams(
            dimension_semantics=("parallel",),
            vmem_limit_bytes=VMEM_LIMIT),
    )(qkv, bias)


# ----------------------------- parameters -----------------------------

def init_params(key, cfg):
    H, I = cfg["hidden"], cfg["intermediate"]
    nH = cfg["num_heads"]
    Dh = H // nH

    def dense(k, fan_in, fan_out):
        return (0.02 * jax.random.normal(k, (fan_in, fan_out), jnp.float32)
                ).astype(jnp.bfloat16)

    keys = iter(jax.random.split(key, 16 + 8 * cfg["num_layers"]))
    params = {
        "word_emb": dense(next(keys), cfg["vocab"], H),
        "pos_emb": dense(next(keys), cfg["max_pos"], H),
        "type_emb": dense(next(keys), 2, H),
        "emb_ln_g": jnp.ones((1, H), jnp.float32),
        "emb_ln_b": jnp.zeros((1, H), jnp.float32),
        "layers": [],
        # Pooler / classifier stay in XLA (tiny N); keep them fp32.
        "pool_w": 0.02 * jax.random.normal(next(keys), (H, H), jnp.float32),
        "pool_b": jnp.zeros((H,), jnp.float32),
        "fc_w": 0.02 * jax.random.normal(next(keys), (H, cfg["num_classes"]),
                                         jnp.float32),
        "fc_b": jnp.zeros((cfg["num_classes"],), jnp.float32),
    }

    q_scale = 1.0 / float(Dh) ** 0.5
    for _ in range(cfg["num_layers"]):
        qkv_w = 0.02 * jax.random.normal(next(keys), (H, 3 * H), jnp.float32)
        qkv_b = jnp.zeros((3 * H,), jnp.float32)
        # Fold the 1/sqrt(Dh) attention scale into the Q projection (cols [:H]).
        qkv_w = qkv_w.at[:, :H].multiply(q_scale)
        qkv_b = qkv_b.at[:H].multiply(q_scale)
        params["layers"].append({
            "qkv_w": qkv_w.astype(jnp.bfloat16),          # fused Q|K|V, [H, 3H]
            "qkv_b": qkv_b.reshape(1, 3 * H),
            "ao_w": dense(next(keys), H, H),
            "ao_b": jnp.zeros((1, H), jnp.float32),
            "ln1_g": jnp.ones((1, H), jnp.float32),
            "ln1_b": jnp.zeros((1, H), jnp.float32),
            "i_w": dense(next(keys), H, I),
            "i_b": jnp.zeros((1, I), jnp.float32),
            "o_w": dense(next(keys), I, H),
            "o_b": jnp.zeros((1, H), jnp.float32),
            "ln2_g": jnp.ones((1, H), jnp.float32),
            "ln2_b": jnp.zeros((1, H), jnp.float32),
        })
    return params


# ----------------------------- forward pass -----------------------------

def bert_classifier_forward(params, x, cfg):
    # Mirrors torch forward: context = x[0]; mask = x[2]; out = fc(pooled).
    context, _, mask = x
    B, S = context.shape
    H = cfg["hidden"]
    nH = cfg["num_heads"]
    Dh = H // nH

    # Embedding gathers/adds are XLA glue; LayerNorm is the Pallas kernel.
    word = params["word_emb"][context]                  # (B, S, H) bf16
    pos = params["pos_emb"][:S][None, :, :]
    typ = params["type_emb"][0][None, None, :]          # TODO(synk): x[1] token_type_ids assumed all-zero.
    emb = (word + pos + typ).reshape(B * S, H)
    h = layer_norm(emb, params["emb_ln_g"], params["emb_ln_b"])

    # Additive key-mask bias kept at (B, 1, S); broadcast inside the kernel.
    attn_bias = ((1.0 - mask.astype(jnp.float32)) * -10000.0)[:, None, :]

    for lyr in params["layers"]:
        qkv = linear(h, lyr["qkv_w"], lyr["qkv_b"])                   # (B*S, 3H)
        # Packed [B, S, 3H] goes straight into attention -- no head transpose.
        ctx = attention(qkv.reshape(B, S, 3 * H), attn_bias,
                        n_heads=nH, head_dim=Dh, hidden=H)            # (B, S, H)
        h = linear_add_ln(ctx.reshape(B * S, H), lyr["ao_w"], lyr["ao_b"], h,
                          lyr["ln1_g"], lyr["ln1_b"])
        # Fused FFN: GELU intermediate never leaves VMEM.
        h = ffn_block(h, lyr["i_w"], lyr["i_b"], lyr["o_w"], lyr["o_b"],
                      lyr["ln2_g"], lyr["ln2_b"])

    seq = h.reshape(B, S, H)
    cls = seq[:, 0, :].astype(jnp.float32)                            # [CLS] (B, H)
    # Pooler + classifier are tiny (N=H / N=num_classes, M=B): leave to XLA.
    pooled = jnp.tanh(cls @ params["pool_w"] + params["pool_b"])
    logits = pooled @ params["fc_w"] + params["fc_b"]                 # (B, classes)
    return logits


# ----------------------------- main -----------------------------

if __name__ == "__main__":
    cfg = dict(vocab=100, hidden=32, num_heads=2, intermediate=64,
               num_layers=2, max_pos=32, num_classes=3)
    B, S = 2, 8

    key = jax.random.PRNGKey(0)
    k_ids, k_params = jax.random.split(key)

    context = jax.random.randint(k_ids, (B, S), 0, cfg["vocab"], dtype=jnp.int32)
    token_type = jnp.zeros((B, S), jnp.int32)             # x[1], unused in forward
    mask = jnp.ones((B, S), jnp.int32).at[1, 6:].set(0)   # pad last tokens of sample 1

    params = init_params(k_params, cfg)

    @jax.jit
    def run(params, context, token_type, mask):
        return bert_classifier_forward(params, (context, token_type, mask), cfg)

    logits = run(params, context, token_type, mask)
    jax.block_until_ready(logits)

    assert logits.shape == (B, cfg["num_classes"])
    assert bool(jnp.all(jnp.isfinite(logits)))
    print("KERNEL_OK")
</pallas_src>

<mosaic_0001>
module attributes {stable_mosaic.version = 11 : i64} {
  func.func @_ln_kernel(%arg0: i32, %arg1: memref<16x32xbf16, #tpu.memory_space<vmem>>, %arg2: memref<1x32xf32, #tpu.memory_space<vmem>>, %arg3: memref<1x32xf32, #tpu.memory_space<vmem>>, %arg4: memref<16x32xbf16, #tpu.memory_space<vmem>>) attributes {dimension_semantics = [#tpu.dimension_semantics<parallel>], iteration_bounds = array<i64: 1>, scalar_prefetch = 0 : i64, scratch_operands = 0 : i64, tpu.core_type = #tpu.core_type<tc>, window_params = [{transform_indices = @transform_0, window_bounds = array<i64: 16, 32>}, {pipeline_mode = #tpu.pipeline_mode<synchronous>, transform_indices = @transform_1, window_bounds = array<i64: 1, 32>}, {pipeline_mode = #tpu.pipeline_mode<synchronous>, transform_indices = @transform_2, window_bounds = array<i64: 1, 32>}, {transform_indices = @transform_3, window_bounds = array<i64: 16, 32>}]} {
    %c0 = arith.constant 0 : index
    %c0_0 = arith.constant 0 : index
    %0 = vector.load %arg1[%c0, %c0_0] : memref<16x32xbf16, #tpu.memory_space<vmem>>, vector<16x32xbf16>
    %1 = arith.extf %0 : vector<16x32xbf16> to vector<16x32xf32>
    %cst = arith.constant dense<0.000000e+00> : vector<16xf32>
    %2 = vector.multi_reduction <add>, %1, %cst [1] : vector<16x32xf32> to vector<16xf32>
    %3 = vector.shape_cast %2 : vector<16xf32> to vector<16x1xf32>
    %cst_1 = arith.constant 3.200000e+01 : f32
    %4 = vector.broadcast %cst_1 : f32 to vector<16x1xf32>
    %5 = arith.divf %3, %4 : vector<16x1xf32>
    %6 = vector.broadcast %5 : vector<16x1xf32> to vector<16x32xf32>
    %7 = arith.subf %1, %6 : vector<16x32xf32>
    %8 = arith.mulf %7, %7 : vector<16x32xf32>
    %cst_2 = arith.constant dense<0.000000e+00> : vector<16xf32>
    %9 = vector.multi_reduction <add>, %8, %cst_2 [1] : vector<16x32xf32> to vector<16xf32>
    %10 = vector.shape_cast %9 : vector<16xf32> to vector<16x1xf32>
    %cst_3 = arith.constant 3.200000e+01 : f32
    %11 = vector.broadcast %cst_3 : f32 to vector<16x1xf32>
    %12 = arith.divf %10, %11 : vector<16x1xf32>
    %13 = vector.broadcast %5 : vector<16x1xf32> to vector<16x32xf32>
    %14 = arith.subf %1, %13 : vector<16x32xf32>
    %cst_4 = arith.constant 9.99999996E-13 : f32
    %15 = vector.broadcast %cst_4 : f32 to vector<16x1xf32>
    %16 = arith.addf %12, %15 : vector<16x1xf32>
    %17 = math.rsqrt %16 : vector<16x1xf32>
    %18 = vector.broadcast %17 : vector<16x1xf32> to vector<16x32xf32>
    %19 = arith.mulf %14, %18 : vector<16x32xf32>
    %c0_5 = arith.constant 0 : index
    %c0_6 = arith.constant 0 : index
    %20 = vector.load %arg2[%c0_5, %c0_6] : memref<1x32xf32, #tpu.memory_space<vmem>>, vector<1x32xf32>
    %21 = vector.broadcast %20 : vector<1x32xf32> to vector<16x32xf32>
    %22 = arith.mulf %19, %21 : vector<16x32xf32>
    %c0_7 = arith.constant 0 : index
    %c0_8 = arith.constant 0 : index
    %23 = vector.load %arg3[%c0_7, %c0_8] : memref<1x32xf32, #tpu.memory_space<vmem>>, vector<1x32xf32>
    %24 = vector.broadcast %23 : vector<1x32xf32> to vector<16x32xf32>
    %25 = arith.addf %22, %24 : vector<16x32xf32>
    %26 = arith.truncf %25 : vector<16x32xf32> to vector<16x32xbf16>
    %c0_9 = arith.constant 0 : index
    %c0_10 = arith.constant 0 : index
    %27 = vector.load %arg4[%c0_9, %c0_10] : memref<16x32xbf16, #tpu.memory_space<vmem>>, vector<16x32xbf16>
    tpu.vector_store %arg4[%c0_9, %c0_10], %26 {strides = array<i32>} : memref<16x32xbf16, #tpu.memory_space<vmem>>, vector<16x32xbf16>,
    return
  }
  func.func @transform_0(%arg0: i32) -> (i32, i32) {
    %c0_i32 = arith.constant 0 : i32
    %c0_i32_0 = arith.constant 0 : i32
    return %arg0, %c0_i32 : i32, i32
  }
  func.func @transform_1(%arg0: i32) -> (i32, i32) {
    %c0_i32 = arith.constant 0 : i32
    %c0_i32_0 = arith.constant 0 : i32
    %c0_i32_1 = arith.constant 0 : i32
    return %c0_i32, %c0_i32_0 : i32, i32
  }
  func.func @transform_2(%arg0: i32) -> (i32, i32) {
    %c0_i32 = arith.constant 0 : i32
    %c0_i32_0 = arith.constant 0 : i32
    %c0_i32_1 = arith.constant 0 : i32
    return %c0_i32, %c0_i32_0 : i32, i32
  }
  func.func @transform_3(%arg0: i32) -> (i32, i32) {
    %c0_i32 = arith.constant 0 : i32
    %c0_i32_0 = arith.constant 0 : i32
    return %arg0, %c0_i32 : i32, i32
  }
}

module attributes {stable_mosaic.version = 11 : i64} {
  func.func @_linear_add_ln_kernel(%arg0: i32, %arg1: i32, %arg2: memref<16x32xbf16, #tpu.memory_space<vmem>>, %arg3: memref<32x32xbf16, #tpu.memory_space<vmem>>, %arg4: memref<1x32xf32, #tpu.memory_space<vmem>>, %arg5: memref<16x32xbf16, #tpu.memory_space<vmem>>, %arg6: memref<1x32xf32, #tpu.memory_space<vmem>>, %arg7: memref<1x32xf32, #tpu.memory_space<vmem>>, %arg8: memref<16x32xbf16, #tpu.memory_space<vmem>>, %arg9: memref<16x32xf32, #tpu.memory_space<vmem>>) attributes {dimension_semantics = [#tpu.dimension_semantics<parallel>, #tpu.dimension_semantics<arbitrary>], iteration_bounds = array<i64: 1, 1>, scalar_prefetch = 0 : i64, scratch_operands = 1 : i64, tpu.core_type = #tpu.core_type<tc>, window_params = [{transform_indices = @transform_0, window_bounds = array<i64: 16, 32>}, {transform_indices = @transform_1, window_bounds = array<i64: 32, 32>}, {pipeline_mode = #tpu.pipeline_mode<synchronous>, transform_indices = @transform_2, window_bounds = array<i64: 1, 32>}, {transform_indices = @transform_3, window_bounds = array<i64: 16, 32>}, {pipeline_mode = #tpu.pipeline_mode<synchronous>, transform_indices = @transform_4, window_bounds = array<i64: 1, 32>}, {pipeline_mode = #tpu.pipeline_mode<synchronous>, transform_indices = @transform_5, window_bounds = array<i64: 1, 32>}, {transform_indices = @transform_6, window_bounds = array<i64: 16, 32>}]} {
    %c0_i32 = arith.constant 0 : i32
    %0 = arith.cmpi eq, %arg1, %c0_i32 : i32
    %1 = arith.extui %0 : i1 to i32
    %c0_i32_0 = arith.constant 0 : i32
    %2 = arith.cmpi ne, %1, %c0_i32_0 : i32
    scf.if %2 {
      %cst_10 = arith.constant 0.000000e+00 : f32
      %12 = vector.broadcast %cst_10 : f32 to vector<16x32xf32>
      %c0_11 = arith.constant 0 : index
      %c0_12 = arith.constant 0 : index
      %13 = vector.load %arg9[%c0_11, %c0_12] : memref<16x32xf32, #tpu.memory_space<vmem>>, vector<16x32xf32>
      tpu.vector_store %arg9[%c0_11, %c0_12], %12 {strides = array<i32>} : memref<16x32xf32, #tpu.memory_space<vmem>>, vector<16x32xf32>,
    } else {
    }
    %c0 = arith.constant 0 : index
    %c0_1 = arith.constant 0 : index
    %3 = vector.load %arg9[%c0, %c0_1] : memref<16x32xf32, #tpu.memory_space<vmem>>, vector<16x32xf32>
    %c0_2 = arith.constant 0 : index
    %c0_3 = arith.constant 0 : index
    %4 = vector.load %arg2[%c0_2, %c0_3] : memref<16x32xbf16, #tpu.memory_space<vmem>>, vector<16x32xbf16>
    %c0_4 = arith.constant 0 : index
    %c0_5 = arith.constant 0 : index
    %5 = vector.load %arg3[%c0_4, %c0_5] : memref<32x32xbf16, #tpu.memory_space<vmem>>, vector<32x32xbf16>
    %cst = arith.constant dense<0.000000e+00> : vector<16x32xf32>
    %6 = tpu.matmul %4, %5, %cst {dimension_numbers = #tpu.dot_dimension_numbers<[1], [0], [0], [1], [0, 0, 1, 1], [], []>} : vector<16x32xbf16>, vector<32x32xbf16>, vector<16x32xf32> -> vector<16x32xf32>
    %7 = arith.addf %3, %6 : vector<16x32xf32>
    %c0_6 = arith.constant 0 : index
    %c0_7 = arith.constant 0 : index
    %8 = vector.load %arg9[%c0_6, %c0_7] : memref<16x32xf32, #tpu.memory_space<vmem>>, vector<16x32xf32>
    tpu.vector_store %arg9[%c0_6, %c0_7], %7 {strides = array<i32>} : memref<16x32xf32, #tpu.memory_space<vmem>>, vector<16x32xf32>,
    %c0_i32_8 = arith.constant 0 : i32
    %9 = arith.cmpi eq, %arg1, %c0_i32_8 : i32
    %10 = arith.extui %9 : i1 to i32
    %c0_i32_9 = arith.constant 0 : i32
    %11 = arith.cmpi ne, %10, %c0_i32_9 : i32
    scf.if %11 {
      %c0_10 = arith.constant 0 : index
      %c0_11 = arith.constant 0 : index
      %12 = vector.load %arg9[%c0_10, %c0_11] : memref<16x32xf32, #tpu.memory_space<vmem>>, vector<16x32xf32>
      %c0_12 = arith.constant 0 : index
      %c0_13 = arith.constant 0 : index
      %13 = vector.load %arg4[%c0_12, %c0_13] : memref<1x32xf32, #tpu.memory_space<vmem>>, vector<1x32xf32>
      %14 = vector.broadcast %13 : vector<1x32xf32> to vector<16x32xf32>
      %15 = arith.addf %12, %14 : vector<16x32xf32>
      %c0_14 = arith.constant 0 : index
      %c0_15 = arith.constant 0 : index
      %16 = vector.load %arg5[%c0_14, %c0_15] : memref<16x32xbf16, #tpu.memory_space<vmem>>, vector<16x32xbf16>
      %17 = arith.extf %16 : vector<16x32xbf16> to vector<16x32xf32>
      %18 = arith.addf %15, %17 : vector<16x32xf32>
      %cst_16 = arith.constant dense<0.000000e+00> : vector<16xf32>
      %19 = vector.multi_reduction <add>, %18, %cst_16 [1] : vector<16x32xf32> to vector<16xf32>
      %20 = vector.shape_cast %19 : vector<16xf32> to vector<16x1xf32>
      %cst_17 = arith.constant 3.200000e+01 : f32
      %21 = vector.broadcast %cst_17 : f32 to vector<16x1xf32>
      %22 = arith.divf %20, %21 : vector<16x1xf32>
      %23 = vector.broadcast %22 : vector<16x1xf32> to vector<16x32xf32>
      %24 = arith.subf %18, %23 : vector<16x32xf32>
      %25 = arith.mulf %24, %24 : vector<16x32xf32>
      %cst_18 = arith.constant dense<0.000000e+00> : vector<16xf32>
      %26 = vector.multi_reduction <add>, %25, %cst_18 [1] : vector<16x32xf32> to vector<16xf32>
      %27 = vector.shape_cast %26 : vector<16xf32> to vector<16x1xf32>
      %cst_19 = arith.constant 3.200000e+01 : f32
      %28 = vector.broadcast %cst_19 : f32 to vector<16x1xf32>
      %29 = arith.divf %27, %28 : vector<16x1xf32>
      %30 = vector.broadcast %22 : vector<16x1xf32> to vector<16x32xf32>
      %31 = arith.subf %18, %30 : vector<16x32xf32>
      %cst_20 = arith.constant 9.99999996E-13 : f32
      %32 = vector.broadcast %cst_20 : f32 to vector<16x1xf32>
      %33 = arith.addf %29, %32 : vector<16x1xf32>
      %34 = math.rsqrt %33 : vector<16x1xf32>
      %35 = vector.broadcast %34 : vector<16x1xf32> to vector<16x32xf32>
      %36 = arith.mulf %31, %35 : vector<16x32xf32>
      %c0_21 = arith.constant 0 : index
      %c0_22 = arith.constant 0 : index
      %37 = vector.load %arg6[%c0_21, %c0_22] : memref<1x32xf32, #tpu.memory_space<vmem>>, vector<1x32xf32>
      %38 = vector.broadcast %37 : vector<1x32xf32> to vector<16x32xf32>
      %39 = arith.mulf %36, %38 : vector<16x32xf32>
      %c0_23 = arith.constant 0 : index
      %c0_24 = arith.constant 0 : index
      %40 = vector.load %arg7[%c0_23, %c0_24] : memref<1x32xf32, #tpu.memory_space<vmem>>, vector<1x32xf32>
      %41 = vector.broadcast %40 : vector<1x32xf32> to vector<16x32xf32>
      %42 = arith.addf %39, %41 : vector<16x32xf32>
      %43 = arith.truncf %42 : vector<16x32xf32> to vector<16x32xbf16>
      %c0_25 = arith.constant 0 : index
      %c0_26 = arith.constant 0 : index
      %44 = vector.load %arg8[%c0_25, %c0_26] : memref<16x32xbf16, #tpu.memory_space<vmem>>, vector<16x32xbf16>
      tpu.vector_store %arg8[%c0_25, %c0_26], %43 {strides = array<i32>} : memref<16x32xbf16, #tpu.memory_space<vmem>>, vector<16x32xbf16>,
    } else {
    }
    return
  }
  func.func @transform_0(%arg0: i32, %arg1: i32) -> (i32, i32) {
    %c0_i32 = arith.constant 0 : i32
    return %arg0, %arg1 : i32, i32
  }
  func.func @transform_1(%arg0: i32, %arg1: i32) -> (i32, i32) {
    %c0_i32 = arith.constant 0 : i32
    %c0_i32_0 = arith.constant 0 : i32
    return %arg1, %c0_i32 : i32, i32
  }
  func.func @transform_2(%arg0: i32, %arg1: i32) -> (i32, i32) {
    %c0_i32 = arith.constant 0 : i32
    %c0_i32_0 = arith.constant 0 : i32
    %c0_i32_1 = arith.constant 0 : i32
    return %c0_i32, %c0_i32_0 : i32, i32
  }
  func.func @transform_3(%arg0: i32, %arg1: i32) -> (i32, i32) {
    %c0_i32 = arith.constant 0 : i32
    %c0_i32_0 = arith.constant 0 : i32
    return %arg0, %c0_i32 : i32, i32
  }
  func.func @transform_4(%arg0: i32, %arg1: i32) -> (i32, i32) {
    %c0_i32 = arith.constant 0 : i32
    %c0_i32_0 = arith.constant 0 : i32
    %c0_i32_1 = arith.constant 0 : i32
    return %c0_i32, %c0_i32_0 : i32, i32
  }
  func.func @transform_5(%arg0: i32, %arg1: i32) -> (i32, i32) {
    %c0_i32 = arith.constant 0 : i32
    %c0_i32_0 = arith.constant 0 : i32
    %c0_i32_1 = arith.constant 0 : i32
    return %c0_i32, %c0_i32_0 : i32, i32
  }
  func.func @transform_6(%arg0: i32, %arg1: i32) -> (i32, i32) {
    %c0_i32 = arith.constant 0 : i32
    %c0_i32_0 = arith.constant 0 : i32
    return %arg0, %c0_i32 : i32, i32
  }
}

module attributes {stable_mosaic.version = 11 : i64} {
  func.func @_linear_kernel(%arg0: i32, %arg1: i32, %arg2: i32, %arg3: memref<16x32xbf16, #tpu.memory_space<vmem>>, %arg4: memref<32x96xbf16, #tpu.memory_space<vmem>>, %arg5: memref<1x96xf32, #tpu.memory_space<vmem>>, %arg6: memref<16x96xbf16, #tpu.memory_space<vmem>>, %arg7: memref<16x96xf32, #tpu.memory_space<vmem>>) attributes {dimension_semantics = [#tpu.dimension_semantics<parallel>, #tpu.dimension_semantics<parallel>, #tpu.dimension_semantics<arbitrary>], iteration_bounds = array<i64: 1, 1, 1>, scalar_prefetch = 0 : i64, scratch_operands = 1 : i64, tpu.core_type = #tpu.core_type<tc>, window_params = [{transform_indices = @transform_0, window_bounds = array<i64: 16, 32>}, {transform_indices = @transform_1, window_bounds = array<i64: 32, 96>}, {transform_indices = @transform_2, window_bounds = array<i64: 1, 96>}, {transform_indices = @transform_3, window_bounds = array<i64: 16, 96>}]} {
    %c0_i32 = arith.constant 0 : i32
    %0 = arith.cmpi eq, %arg2, %c0_i32 : i32
    %1 = arith.extui %0 : i1 to i32
    %c0_i32_0 = arith.constant 0 : i32
    %2 = arith.cmpi ne, %1, %c0_i32_0 : i32
    scf.if %2 {
      %cst_10 = arith.constant 0.000000e+00 : f32
      %12 = vector.broadcast %cst_10 : f32 to vector<16x96xf32>
      %c0_11 = arith.constant 0 : index
      %c0_12 = arith.constant 0 : index
      %13 = vector.load %arg7[%c0_11, %c0_12] : memref<16x96xf32, #tpu.memory_space<vmem>>, vector<16x96xf32>
      tpu.vector_store %arg7[%c0_11, %c0_12], %12 {strides = array<i32>} : memref<16x96xf32, #tpu.memory_space<vmem>>, vector<16x96xf32>,
    } else {
    }
    %c0 = arith.constant 0 : index
    %c0_1 = arith.constant 0 : index
    %3 = vector.load %arg7[%c0, %c0_1] : memref<16x96xf32, #tpu.memory_space<vmem>>, vector<16x96xf32>
    %c0_2 = arith.constant 0 : index
    %c0_3 = arith.constant 0 : index
    %4 = vector.load %arg3[%c0_2, %c0_3] : memref<16x32xbf16, #tpu.memory_space<vmem>>, vector<16x32xbf16>
    %c0_4 = arith.constant 0 : index
    %c0_5 = arith.constant 0 : index
    %5 = vector.load %arg4[%c0_4, %c0_5] : memref<32x96xbf16, #tpu.memory_space<vmem>>, vector<32x96xbf16>
    %cst = arith.constant dense<0.000000e+00> : vector<16x96xf32>
    %6 = tpu.matmul %4, %5, %cst {dimension_numbers = #tpu.dot_dimension_numbers<[1], [0], [0], [1], [0, 0, 1, 1], [], []>} : vector<16x32xbf16>, vector<32x96xbf16>, vector<16x96xf32> -> vector<16x96xf32>
    %7 = arith.addf %3, %6 : vector<16x96xf32>
    %c0_6 = arith.constant 0 : index
    %c0_7 = arith.constant 0 : index
    %8 = vector.load %arg7[%c0_6, %c0_7] : memref<16x96xf32, #tpu.memory_space<vmem>>, vector<16x96xf32>
    tpu.vector_store %arg7[%c0_6, %c0_7], %7 {strides = array<i32>} : memref<16x96xf32, #tpu.memory_space<vmem>>, vector<16x96xf32>,
    %c0_i32_8 = arith.constant 0 : i32
    %9 = arith.cmpi eq, %arg2, %c0_i32_8 : i32
    %10 = arith.extui %9 : i1 to i32
    %c0_i32_9 = arith.constant 0 : i32
    %11 = arith.cmpi ne, %10, %c0_i32_9 : i32
    scf.if %11 {
      %c0_10 = arith.constant 0 : index
      %c0_11 = arith.constant 0 : index
      %12 = vector.load %arg7[%c0_10, %c0_11] : memref<16x96xf32, #tpu.memory_space<vmem>>, vector<16x96xf32>
      %c0_12 = arith.constant 0 : index
      %c0_13 = arith.constant 0 : index
      %13 = vector.load %arg5[%c0_12, %c0_13] : memref<1x96xf32, #tpu.memory_space<vmem>>, vector<1x96xf32>
      %14 = vector.broadcast %13 : vector<1x96xf32> to vector<16x96xf32>
      %15 = arith.addf %12, %14 : vector<16x96xf32>
      %16 = arith.truncf %15 : vector<16x96xf32> to vector<16x96xbf16>
      %c0_14 = arith.constant 0 : index
      %c0_15 = arith.constant 0 : index
      %17 = vector.load %arg6[%c0_14, %c0_15] : memref<16x96xbf16, #tpu.memory_space<vmem>>, vector<16x96xbf16>
      tpu.vector_store %arg6[%c0_14, %c0_15], %16 {strides = array<i32>} : memref<16x96xbf16, #tpu.memory_space<vmem>>, vector<16x96xbf16>,
    } else {
    }
    return
  }
  func.func @transform_0(%arg0: i32, %arg1: i32, %arg2: i32) -> (i32, i32) {
    %c0_i32 = arith.constant 0 : i32
    return %arg0, %arg2 : i32, i32
  }
  func.func @transform_1(%arg0: i32, %arg1: i32, %arg2: i32) -> (i32, i32) {
    %c0_i32 = arith.constant 0 : i32
    return %arg2, %arg1 : i32, i32
  }
  func.func @transform_2(%arg0: i32, %arg1: i32, %arg2: i32) -> (i32, i32) {
    %c0_i32 = arith.constant 0 : i32
    %c0_i32_0 = arith.constant 0 : i32
    return %c0_i32, %arg1 : i32, i32
  }
  func.func @transform_3(%arg0: i32, %arg1: i32, %arg2: i32) -> (i32, i32) {
    %c0_i32 = arith.constant 0 : i32
    return %arg0, %arg1 : i32, i32
  }
}

module attributes {stable_mosaic.version = 11 : i64} {
  func.func @_attention_kernel(%arg0: i32, %arg1: memref<1x8x96xbf16, #tpu.memory_space<vmem>>, %arg2: memref<1x1x8xf32, #tpu.memory_space<vmem>>, %arg3: memref<1x8x32xbf16, #tpu.memory_space<vmem>>) attributes {dimension_semantics = [#tpu.dimension_semantics<parallel>], iteration_bounds = array<i64: 2>, scalar_prefetch = 0 : i64, scratch_operands = 0 : i64, tpu.core_type = #tpu.core_type<tc>, window_params = [{transform_indices = @transform_0, window_bounds = array<i64: 1, 8, 96>}, {transform_indices = @transform_1, window_bounds = array<i64: 1, 1, 8>}, {transform_indices = @transform_2, window_bounds = array<i64: 1, 8, 32>}]} {
    %c0 = arith.constant 0 : index
    %c0_0 = arith.constant 0 : index
    %c0_1 = arith.constant 0 : index
    %0 = vector.load %arg2[%c0, %c0_0, %c0_1] : memref<1x1x8xf32, #tpu.memory_space<vmem>>, vector<1x1x8xf32>
    %1 = vector.shape_cast %0 : vector<1x1x8xf32> to vector<1x8xf32>
    %c0_2 = arith.constant 0 : index
    %c0_3 = arith.constant 0 : index
    %c0_4 = arith.constant 0 : index
    %2 = vector.load %arg1[%c0_2, %c0_3, %c0_4] : memref<1x8x96xbf16, #tpu.memory_space<vmem>>, vector<1x8x16xbf16>
    %3 = vector.shape_cast %2 : vector<1x8x16xbf16> to vector<8x16xbf16>
    %c0_5 = arith.constant 0 : index
    %c0_6 = arith.constant 0 : index
    %c32 = arith.constant 32 : index
    %4 = vector.load %arg1[%c0_5, %c0_6, %c32] : memref<1x8x96xbf16, #tpu.memory_space<vmem>>, vector<1x8x16xbf16>
    %5 = vector.shape_cast %4 : vector<1x8x16xbf16> to vector<8x16xbf16>
    %c0_7 = arith.constant 0 : index
    %c0_8 = arith.constant 0 : index
    %c64 = arith.constant 64 : index
    %6 = vector.load %arg1[%c0_7, %c0_8, %c64] : memref<1x8x96xbf16, #tpu.memory_space<vmem>>, vector<1x8x16xbf16>
    %7 = vector.shape_cast %6 : vector<1x8x16xbf16> to vector<8x16xbf16>
    %cst = arith.constant dense<0.000000e+00> : vector<8x8xf32>
    %8 = tpu.matmul %3, %5, %cst {dimension_numbers = #tpu.dot_dimension_numbers<[1], [1], [0], [0], [0, 0, 1, 0], [], []>} : vector<8x16xbf16>, vector<8x16xbf16>, vector<8x8xf32> -> vector<8x8xf32>
    %9 = vector.broadcast %1 : vector<1x8xf32> to vector<8x8xf32>
    %10 = arith.addf %8, %9 : vector<8x8xf32>
    %cst_9 = arith.constant dense<0xFF800000> : vector<8xf32>
    %11 = vector.multi_reduction <maximumf>, %10, %cst_9 [1] : vector<8x8xf32> to vector<8xf32>
    %12 = vector.shape_cast %11 : vector<8xf32> to vector<8x1xf32>
    %13 = vector.broadcast %12 : vector<8x1xf32> to vector<8x8xf32>
    %14 = arith.subf %10, %13 : vector<8x8xf32>
    %15 = math.exp %14 : vector<8x8xf32>
    %cst_10 = arith.constant dense<0.000000e+00> : vector<8xf32>
    %16 = vector.multi_reduction <add>, %15, %cst_10 [1] : vector<8x8xf32> to vector<8xf32>
    %17 = vector.shape_cast %16 : vector<8xf32> to vector<8x1xf32>
    %18 = tpu.reciprocal %17 {approx = true} : vector<8x1xf32> -> vector<8x1xf32>
    %19 = vector.broadcast %18 : vector<8x1xf32> to vector<8x8xf32>
    %20 = arith.mulf %15, %19 : vector<8x8xf32>
    %21 = arith.truncf %20 : vector<8x8xf32> to vector<8x8xbf16>
    %cst_11 = arith.constant dense<0.000000e+00> : vector<8x16xf32>
    %22 = tpu.matmul %21, %7, %cst_11 {dimension_numbers = #tpu.dot_dimension_numbers<[1], [0], [0], [1], [0, 0, 1, 1], [], []>} : vector<8x8xbf16>, vector<8x16xbf16>, vector<8x16xf32> -> vector<8x16xf32>
    %23 = arith.truncf %22 : vector<8x16xf32> to vector<8x16xbf16>
    %c0_12 = arith.constant 0 : index
    %c0_13 = arith.constant 0 : index
    %c0_14 = arith.constant 0 : index
    %24 = vector.load %arg3[%c0_12, %c0_13, %c0_14] : memref<1x8x32xbf16, #tpu.memory_space<vmem>>, vector<1x8x16xbf16>
    %25 = vector.shape_cast %24 : vector<1x8x16xbf16> to vector<8x16xbf16>
    %26 = vector.shape_cast %23 : vector<8x16xbf16> to vector<1x8x16xbf16>
    tpu.vector_store %arg3[%c0_12, %c0_13, %c0_14], %26 {strides = array<i32>} : memref<1x8x32xbf16, #tpu.memory_space<vmem>>, vector<1x8x16xbf16>,
    %c0_15 = arith.constant 0 : index
    %c0_16 = arith.constant 0 : index
    %c16 = arith.constant 16 : index
    %27 = vector.load %arg1[%c0_15, %c0_16, %c16] : memref<1x8x96xbf16, #tpu.memory_space<vmem>>, vector<1x8x16xbf16>
    %28 = vector.shape_cast %27 : vector<1x8x16xbf16> to vector<8x16xbf16>
    %c0_17 = arith.constant 0 : index
    %c0_18 = arith.constant 0 : index
    %c48 = arith.constant 48 : index
    %29 = vector.load %arg1[%c0_17, %c0_18, %c48] : memref<1x8x96xbf16, #tpu.memory_space<vmem>>, vector<1x8x16xbf16>
    %30 = vector.shape_cast %29 : vector<1x8x16xbf16> to vector<8x16xbf16>
    %c0_19 = arith.constant 0 : index
    %c0_20 = arith.constant 0 : index
    %c80 = arith.constant 80 : index
    %31 = vector.load %arg1[%c0_19, %c0_20, %c80] : memref<1x8x96xbf16, #tpu.memory_space<vmem>>, vector<1x8x16xbf16>
    %32 = vector.shape_cast %31 : vector<1x8x16xbf16> to vector<8x16xbf16>
    %cst_21 = arith.constant dense<0.000000e+00> : vector<8x8xf32>
    %33 = tpu.matmul %28, %30, %cst_21 {dimension_numbers = #tpu.dot_dimension_numbers<[1], [1], [0], [0], [0, 0, 1, 0], [], []>} : vector<8x16xbf16>, vector<8x16xbf16>, vector<8x8xf32> -> vector<8x8xf32>
    %34 = vector.broadcast %1 : vector<1x8xf32> to vector<8x8xf32>
    %35 = arith.addf %33, %34 : vector<8x8xf32>
    %cst_22 = arith.constant dense<0xFF800000> : vector<8xf32>
    %36 = vector.multi_reduction <maximumf>, %35, %cst_22 [1] : vector<8x8xf32> to vector<8xf32>
    %37 = vector.shape_cast %36 : vector<8xf32> to vector<8x1xf32>
    %38 = vector.broadcast %37 : vector<8x1xf32> to vector<8x8xf32>
    %39 = arith.subf %35, %38 : vector<8x8xf32>
    %40 = math.exp %39 : vector<8x8xf32>
    %cst_23 = arith.constant dense<0.000000e+00> : vector<8xf32>
    %41 = vector.multi_reduction <add>, %40, %cst_23 [1] : vector<8x8xf32> to vector<8xf32>
    %42 = vector.shape_cast %41 : vector<8xf32> to vector<8x1xf32>
    %43 = tpu.reciprocal %42 {approx = true} : vector<8x1xf32> -> vector<8x1xf32>
    %44 = vector.broadcast %43 : vector<8x1xf32> to vector<8x8xf32>
    %45 = arith.mulf %40, %44 : vector<8x8xf32>
    %46 = arith.truncf %45 : vector<8x8xf32> to vector<8x8xbf16>
    %cst_24 = arith.constant dense<0.000000e+00> : vector<8x16xf32>
    %47 = tpu.matmul %46, %32, %cst_24 {dimension_numbers = #tpu.dot_dimension_numbers<[1], [0], [0], [1], [0, 0, 1, 1], [], []>} : vector<8x8xbf16>, vector<8x16xbf16>, vector<8x16xf32> -> vector<8x16xf32>
    %48 = arith.truncf %47 : vector<8x16xf32> to vector<8x16xbf16>
    %c0_25 = arith.constant 0 : index
    %c0_26 = arith.constant 0 : index
    %c16_27 = arith.constant 16 : index
    %49 = vector.load %arg3[%c0_25, %c0_26, %c16_27] : memref<1x8x32xbf16, #tpu.memory_space<vmem>>, vector<1x8x16xbf16>
    %50 = vector.shape_cast %49 : vector<1x8x16xbf16> to vector<8x16xbf16>
    %51 = vector.shape_cast %48 : vector<8x16xbf16> to vector<1x8x16xbf16>
    tpu.vector_store %arg3[%c0_25, %c0_26, %c16_27], %51 {strides = array<i32>} : memref<1x8x32xbf16, #tpu.memory_space<vmem>>, vector<1x8x16xbf16>,
    return
  }
  func.func @transform_0(%arg0: i32) -> (i32, i32, i32) {
    %c0_i32 = arith.constant 0 : i32
    %c0_i32_0 = arith.constant 0 : i32
    %c0_i32_1 = arith.constant 0 : i32
    return %arg0, %c0_i32, %c0_i32_0 : i32, i32, i32
  }
  func.func @transform_1(%arg0: i32) -> (i32, i32, i32) {
    %c0_i32 = arith.constant 0 : i32
    %c0_i32_0 = arith.constant 0 : i32
    %c0_i32_1 = arith.constant 0 : i32
    return %arg0, %c0_i32, %c0_i32_0 : i32, i32, i32
  }
  func.func @transform_2(%arg0: i32) -> (i32, i32, i32) {
    %c0_i32 = arith.constant 0 : i32
    %c0_i32_0 = arith.constant 0 : i32
    %c0_i32_1 = arith.constant 0 : i32
    return %arg0, %c0_i32, %c0_i32_0 : i32, i32, i32
  }
}

module attributes {stable_mosaic.version = 11 : i64} {
  func.func @_ffn_kernel(%arg0: i32, %arg1: memref<16x32xbf16, #tpu.memory_space<vmem>>, %arg2: memref<32x64xbf16, #tpu.memory_space<vmem>>, %arg3: memref<1x64xf32, #tpu.memory_space<vmem>>, %arg4: memref<64x32xbf16, #tpu.memory_space<vmem>>, %arg5: memref<1x32xf32, #tpu.memory_space<vmem>>, %arg6: memref<1x32xf32, #tpu.memory_space<vmem>>, %arg7: memref<1x32xf32, #tpu.memory_space<vmem>>, %arg8: memref<16x32xbf16, #tpu.memory_space<vmem>>) attributes {dimension_semantics = [#tpu.dimension_semantics<parallel>], iteration_bounds = array<i64: 1>, scalar_prefetch = 0 : i64, scratch_operands = 0 : i64, tpu.core_type = #tpu.core_type<tc>, window_params = [{transform_indices = @transform_0, window_bounds = array<i64: 16, 32>}, {pipeline_mode = #tpu.pipeline_mode<synchronous>, transform_indices = @transform_1, window_bounds = array<i64: 32, 64>}, {pipeline_mode = #tpu.pipeline_mode<synchronous>, transform_indices = @transform_2, window_bounds = array<i64: 1, 64>}, {pipeline_mode = #tpu.pipeline_mode<synchronous>, transform_indices = @transform_3, window_bounds = array<i64: 64, 32>}, {pipeline_mode = #tpu.pipeline_mode<synchronous>, transform_indices = @transform_4, window_bounds = array<i64: 1, 32>}, {pipeline_mode = #tpu.pipeline_mode<synchronous>, transform_indices = @transform_5, window_bounds = array<i64: 1, 32>}, {pipeline_mode = #tpu.pipeline_mode<synchronous>, transform_indices = @transform_6, window_bounds = array<i64: 1, 32>}, {transform_indices = @transform_7, window_bounds = array<i64: 16, 32>}]} {
    %c0 = arith.constant 0 : index
    %c0_0 = arith.constant 0 : index
    %0 = vector.load %arg1[%c0, %c0_0] : memref<16x32xbf16, #tpu.memory_space<vmem>>, vector<16x32xbf16>
    %c0_1 = arith.constant 0 : index
    %c0_2 = arith.constant 0 : index
    %1 = vector.load %arg2[%c0_1, %c0_2] : memref<32x64xbf16, #tpu.memory_space<vmem>>, vector<32x64xbf16>
    %cst = arith.constant dense<0.000000e+00> : vector<16x64xf32>
    %2 = tpu.matmul %0, %1, %cst {dimension_numbers = #tpu.dot_dimension_numbers<[1], [0], [0], [1], [0, 0, 1, 1], [], []>} : vector<16x32xbf16>, vector<32x64xbf16>, vector<16x64xf32> -> vector<16x64xf32>
    %c0_3 = arith.constant 0 : index
    %c0_4 = arith.constant 0 : index
    %3 = vector.load %arg3[%c0_3, %c0_4] : memref<1x64xf32, #tpu.memory_space<vmem>>, vector<1x64xf32>
    %4 = vector.broadcast %3 : vector<1x64xf32> to vector<16x64xf32>
    %5 = arith.addf %2, %4 : vector<16x64xf32>
    %cst_5 = arith.constant -1.702000e+00 : f32
    %6 = vector.broadcast %cst_5 : f32 to vector<16x64xf32>
    %7 = arith.mulf %6, %5 : vector<16x64xf32>
    %8 = math.exp %7 : vector<16x64xf32>
    %cst_6 = arith.constant 1.000000e+00 : f32
    %9 = vector.broadcast %cst_6 : f32 to vector<16x64xf32>
    %10 = arith.addf %9, %8 : vector<16x64xf32>
    %cst_7 = arith.constant 1.000000e+00 : f32
    %11 = vector.broadcast %cst_7 : f32 to vector<16x64xf32>
    %12 = arith.divf %11, %10 : vector<16x64xf32>
    %13 = arith.mulf %5, %12 : vector<16x64xf32>
    %14 = arith.truncf %13 : vector<16x64xf32> to vector<16x64xbf16>
    %c0_8 = arith.constant 0 : index
    %c0_9 = arith.constant 0 : index
    %15 = vector.load %arg4[%c0_8, %c0_9] : memref<64x32xbf16, #tpu.memory_space<vmem>>, vector<64x32xbf16>
    %cst_10 = arith.constant dense<0.000000e+00> : vector<16x32xf32>
    %16 = tpu.matmul %14, %15, %cst_10 {dimension_numbers = #tpu.dot_dimension_numbers<[1], [0], [0], [1], [0, 0, 1, 1], [], []>} : vector<16x64xbf16>, vector<64x32xbf16>, vector<16x32xf32> -> vector<16x32xf32>
    %c0_11 = arith.constant 0 : index
    %c0_12 = arith.constant 0 : index
    %17 = vector.load %arg5[%c0_11, %c0_12] : memref<1x32xf32, #tpu.memory_space<vmem>>, vector<1x32xf32>
    %18 = vector.broadcast %17 : vector<1x32xf32> to vector<16x32xf32>
    %19 = arith.addf %16, %18 : vector<16x32xf32>
    %20 = arith.extf %0 : vector<16x32xbf16> to vector<16x32xf32>
    %21 = arith.addf %19, %20 : vector<16x32xf32>
    %cst_13 = arith.constant dense<0.000000e+00> : vector<16xf32>
    %22 = vector.multi_reduction <add>, %21, %cst_13 [1] : vector<16x32xf32> to vector<16xf32>
    %23 = vector.shape_cast %22 : vector<16xf32> to vector<16x1xf32>
    %cst_14 = arith.constant 3.200000e+01 : f32
    %24 = vector.broadcast %cst_14 : f32 to vector<16x1xf32>
    %25 = arith.divf %23, %24 : vector<16x1xf32>
    %26 = vector.broadcast %25 : vector<16x1xf32> to vector<16x32xf32>
    %27 = arith.subf %21, %26 : vector<16x32xf32>
    %28 = arith.mulf %27, %27 : vector<16x32xf32>
    %cst_15 = arith.constant dense<0.000000e+00> : vector<16xf32>
    %29 = vector.multi_reduction <add>, %28, %cst_15 [1] : vector<16x32xf32> to vector<16xf32>
    %30 = vector.shape_cast %29 : vector<16xf32> to vector<16x1xf32>
    %cst_16 = arith.constant 3.200000e+01 : f32
    %31 = vector.broadcast %cst_16 : f32 to vector<16x1xf32>
    %32 = arith.divf %30, %31 : vector<16x1xf32>
    %33 = vector.broadcast %25 : vector<16x1xf32> to vector<16x32xf32>
    %34 = arith.subf %21, %33 : vector<16x32xf32>
    %cst_17 = arith.constant 9.99999996E-13 : f32
    %35 = vector.broadcast %cst_17 : f32 to vector<16x1xf32>
    %36 = arith.addf %32, %35 : vector<16x1xf32>
    %37 = math.rsqrt %36 : vector<16x1xf32>
    %38 = vector.broadcast %37 : vector<16x1xf32> to vector<16x32xf32>
    %39 = arith.mulf %34, %38 : vector<16x32xf32>
    %c0_18 = arith.constant 0 : index
    %c0_19 = arith.constant 0 : index
    %40 = vector.load %arg6[%c0_18, %c0_19] : memref<1x32xf32, #tpu.memory_space<vmem>>, vector<1x32xf32>
    %41 = vector.broadcast %40 : vector<1x32xf32> to vector<16x32xf32>
    %42 = arith.mulf %39, %41 : vector<16x32xf32>
    %c0_20 = arith.constant 0 : index
    %c0_21 = arith.constant 0 : index
    %43 = vector.load %arg7[%c0_20, %c0_21] : memref<1x32xf32, #tpu.memory_space<vmem>>, vector<1x32xf32>
    %44 = vector.broadcast %43 : vector<1x32xf32> to vector<16x32xf32>
    %45 = arith.addf %42, %44 : vector<16x32xf32>
    %46 = arith.truncf %45 : vector<16x32xf32> to vector<16x32xbf16>
    %c0_22 = arith.constant 0 : index
    %c0_23 = arith.constant 0 : index
    %47 = vector.load %arg8[%c0_22, %c0_23] : memref<16x32xbf16, #tpu.memory_space<vmem>>, vector<16x32xbf16>
    tpu.vector_store %arg8[%c0_22, %c0_23], %46 {strides = array<i32>} : memref<16x32xbf16, #tpu.memory_space<vmem>>, vector<16x32xbf16>,
    return
  }
  func.func @transform_0(%arg0: i32) -> (i32, i32) {
    %c0_i32 = arith.constant 0 : i32
    %c0_i32_0 = arith.constant 0 : i32
    return %arg0, %c0_i32 : i32, i32
  }
  func.func @transform_1(%arg0: i32) -> (i32, i32) {
    %c0_i32 = arith.constant 0 : i32
    %c0_i32_0 = arith.constant 0 : i32
    %c0_i32_1 = arith.constant 0 : i32
    return %c0_i32, %c0_i32_0 : i32, i32
  }
  func.func @transform_2(%arg0: i32) -> (i32, i32) {
    %c0_i32 = arith.constant 0 : i32
    %c0_i32_0 = arith.constant 0 : i32
    %c0_i32_1 = arith.constant 0 : i32
    return %c0_i32, %c0_i32_0 : i32, i32
  }
  func.func @transform_3(%arg0: i32) -> (i32, i32) {
    %c0_i32 = arith.constant 0 : i32
    %c0_i32_0 = arith.constant 0 : i32
    %c0_i32_1 = arith.constant 0 : i32
    return %c0_i32, %c0_i32_0 : i32, i32
  }
  func.func @transform_4(%arg0: i32) -> (i32, i32) {
    %c0_i32 = arith.constant 0 : i32
    %c0_i32_0 = arith.constant 0 : i32
    %c0_i32_1 = arith.constant 0 : i32
    return %c0_i32, %c0_i32_0 : i32, i32
  }
  func.func @transform_5(%arg0: i32) -> (i32, i32) {
    %c0_i32 = arith.constant 0 : i32
    %c0_i32_0 = arith.constant 0 : i32
    %c0_i32_1 = arith.constant 0 : i32
    return %c0_i32, %c0_i32_0 : i32, i32
  }
  func.func @transform_6(%arg0: i32) -> (i32, i32) {
    %c0_i32 = arith.constant 0 : i32
    %c0_i32_0 = arith.constant 0 : i32
    %c0_i32_1 = arith.constant 0 : i32
    return %c0_i32, %c0_i32_0 : i32, i32
  }
  func.func @transform_7(%arg0: i32) -> (i32, i32) {
    %c0_i32 = arith.constant 0 : i32
    %c0_i32_0 = arith.constant 0 : i32
    return %arg0, %c0_i32 : i32, i32
  }
}

</mosaic_0001>

<bundles_post_ra>
// kernel: run.9
= control target key start
LH: loop header
LB: loop body
LE: loop exit
PB: predicated region body
PF: predicated region fallthrough
CT: control target
= control target key end

     0   :  { %vm18_vm0 = vcmask 261120   ;;  %v104_v5 = vmov 32.0   ;;  %vm84_vm6 = vcmask 257024   ;;  %s144_s0 = inlined_call_operand.vmem [shape: bf16[16,32], index: 0, kind: input, shape index: {}]   ;;  %s145_s1 = inlined_call_operand.vmem [shape: f32[1,32], index: 1, kind: input, shape index: {}]   ;;  %s146_s2 = inlined_call_operand.vmem [shape: f32[1,32], index: 2, kind: input, shape index: {}]   ;;  %s147_s3 = inlined_call_operand.vmem [shape: bf16[16,32], index: 3, kind: output, shape index: {}]  }
   0x1   :  { %v92_v0 = vld [vmem:[%s144_s0] sm:$0xff]   ;;  %98 = vrcp.f32 %v104_v5 }
   0x2   :  { %v93_v1 = vunpack.c.l.bf16 %v92_v0  ;;  %v94_v3 = vunpack.c.h.bf16 %v92_v0  ;;  %v96_v36 = vld [vmem:[%s145_s1] ss:$0 sm:$0xff] }
   0x3   :  { %v97_v39 = vld [vmem:[%s146_s2] ss:$0 sm:$0xff] }
   0x4   :  { %v19_v2 = vsel %vm18_vm0, %v93_v1, 0.0  ;;  %v22_v4 = vsel %vm18_vm0, %v94_v3, 0.0 }
   0x5   :  { %20 = vadd.xlane.f32.xlu0 %v19_v2 }
   0x7   :  { %v99_v6 = vpop.eup %98 }
   0x8   :  { %v26_v7 = vmul.f32 32.0, %v99_v6  ;;  %vm30_vm1 = vweird.f32 %v99_v6 }
   0xa   :  { %v27_v8 = vsub.f32 1.0, %v26_v7 }
   0xc   :  { %v28_v9 = vmul.f32 %v99_v6, %v27_v8 }
   0xd   :  { %23 = vadd.xlane.f32.xlu0 %v22_v4 }
   0xe   :  { %v29_v10 = vadd.f32 %v99_v6, %v28_v9 }
  0x10   :  { %v31_v11 = vsel %vm30_vm1, %v99_v6, %v29_v10 }
  0x78   :  { %v21_v12 = vpop.xlane.xlu0 %20 }
  0x79   :  { %v32_v13 = vmul.f32 %v31_v11, %v21_v12 }
  0x7b   :  { %v34_v14 = vsub.f32 %v93_v1, %v32_v13 }
  0x7d   :  { %v36_v15 = vmul.f32 %v34_v14, %v34_v14 }
  0x7f   :  { %v38_v16 = vsel %vm18_vm0, %v36_v15, 0.0 }
  0x80   :  { %39 = vadd.xlane.f32.xlu1 %v38_v16  ;;  %v24_v17 = vpop.xlane.xlu0 %23 }
  0x81   :  { %v33_v18 = vmul.f32 %v31_v11, %v24_v17 }
  0x83   :  { %v35_v19 = vsub.f32 %v94_v3, %v33_v18 }
  0x85   :  { %v37_v20 = vmul.f32 %v35_v19, %v35_v19 }
  0x87   :  { %v41_v21 = vsel %vm18_vm0, %v37_v20, 0.0 }
  0x88   :  { %42 = vadd.xlane.f32.xlu1 %v41_v21 }
  0xf3   :  { %v40_v22 = vpop.xlane.xlu1 %39 }
  0xf4   :  { %v44_v23 = vmul.f32 %v40_v22, %v31_v11 }
  0xf6   :  { %v46_v24 = vadd.f32 1e-12, %v44_v23 }
  0xf8   :  { %100 = vrsqrt.f32 %v46_v24  ;;  %vm54_vm3 = vweird.f32 %v46_v24 }
  0xfb   :  { %v43_v25 = vpop.xlane.xlu1 %42 }
  0xfc   :  { %v45_v26 = vmul.f32 %v43_v25, %v31_v11 }
  0xfe   :  { %v101_v27 = vpop.eup %100  ;;  %v47_v28 = vadd.f32 1e-12, %v45_v26 }
  0xff   :  { %v49_v29 = vmul.f32 %v101_v27, %v46_v24  ;;  %vm55_vm2 = vweird.f32 %v101_v27 }
 0x100   :  { %102 = vrsqrt.f32 %v47_v28  ;;  %vm56_vm4 = vmor %vm54_vm3, %vm55_vm2  ;;  %vm64_vm7 = vweird.f32 %v47_v28 }
 0x101   :  { %v50_v30 = vmul.f32 %v101_v27, %v49_v29 }
 0x103   :  { %v51_v31 = vmul.f32 0.5, %v50_v30 }
 0x105   :  { %v52_v32 = vsub.f32 1.5, %v51_v31 }
 0x106   :  { %v103_v33 = vpop.eup %102 }
 0x107   :  { %v53_v34 = vmul.f32 %v101_v27, %v52_v32  ;;  %v59_v35 = vmul.f32 %v103_v33, %v47_v28  ;;  %vm65_vm5 = vweird.f32 %v103_v33 }
 0x108   :  { %vm66_vm8 = vmor %vm64_vm7, %vm65_vm5 }
 0x109   :  { %v57_v37 = vsel %vm56_vm4, %v101_v27, %v53_v34  ;;  %v60_v38 = vmul.f32 %v103_v33, %v59_v35 }
 0x10a   :  { %v68_v40 = vmul.f32 %v57_v37, %v34_v14 }
 0x10b   :  { %v61_v41 = vmul.f32 0.5, %v60_v38 }
 0x10c   :  { %v74_v42 = vmul.f32 %v96_v36, %v68_v40 }
 0x10d   :  { %v62_v43 = vsub.f32 1.5, %v61_v41 }
 0x10e   :  { %v80_v44 = vadd.f32 %v97_v39, %v74_v42 }
 0x10f   :  { %v63_v45 = vmul.f32 %v103_v33, %v62_v43 }
 0x110   :  { %v82_v46 = vpack.c.bf16 %v80_v44, %v80_v44 }
 0x111   :  { %v67_v47 = vsel %vm66_vm8, %v103_v33, %v63_v45 }
 0x112   :  { %85 = vst.msk [vmem:[%s147_s3] sm:$0xf] %vm84_vm6, %v82_v46  ;;  %v69_v48 = vmul.f32 %v67_v47, %v35_v19 }
 0x114   :  { %v75_v49 = vmul.f32 %v96_v36, %v69_v48 }
 0x116   :  { %v81_v50 = vadd.f32 %v97_v39, %v75_v49 }
 0x118   :  { %v83_v51 = vpack.c.bf16 %v81_v50, %v81_v50 }
 0x11a   :  { %86 = vst.msk [vmem:[%s147_s3 + $0x4] sm:$0xf] %vm84_vm6, %v83_v51 }

// kernel: run.11
= control target key start
LH: loop header
LB: loop body
LE: loop exit
PB: predicated region body
PF: predicated region fallthrough
CT: control target
= control target key end

     0   :  { %s416_s9 = smov 0   ;;  %s450_s0 = inlined_call_operand.vmem [shape: bf16[2,8,96], index: 0, kind: input, shape index: {}]   ;;  %s451_s1 = inlined_call_operand.vmem [shape: f32[2,1,8], index: 1, kind: input, shape index: {}]   ;;  %s452_s2 = inlined_call_operand.vmem [shape: bf16[2,8,32], index: 2, kind: output, shape index: {}]  }
   0x1 LB: > { %s351_s10 = sadd.s32 4294967295, %s393_s9   ;;  %p355_p0 = scmp.ge.s32.totalorder %s393_s9, 1  ;;  %s393_s9 = sphi %s416_s9, %s12_s9  }
   0x2   : > { %p119_p1 = scmp.lt.s32.totalorder %s393_s9, 3 }
   0x4   : > { %p120_p2 = pnand %p355_p0, %p119_p1 }
   0x5   : > { %p142_p3 = scmp.lt.s32.totalorder (!%p120_p2), %s351_s10, 1  ;;  %s395_s18 = smov (!%p120_p2), 80  }
   0x6   : > { %123 = sbr.rel (%p120_p2) target bundleno = 758 (0x2f6), region = 28  ;;  %s396_s19 = smov (!%p120_p2), 96  }
   0x7   : > { %s397_s20 = smov (!%p120_p2), 112   ;;  %s398_s21 = smov (!%p120_p2), 48  }
   0x8   : > { %s399_s22 = smov (!%p120_p2), 64   ;;  %s400_s26 = smov (!%p120_p2), 16  }
   0xb   : > { %s454_s10 = smov (!%p142_p3, %s351_s10), 1  ;;  %vm164_vm0 = vcmask 130048   ;;  %vm184_vm1 = vcmask 64512   ;;  %vm202_vm2 = vcmask 1043456   ;;  %vm220_vm3 = vcmask 125952  }
   0xc   : > { %s356_s11 = sshll.u32 %s454_s10, 2  ;;  %s148_s17 = scalar_lea.vmem %s451_s1, %s454_s10  ;;  %vm287_vm4 = vcmask 257152  }
   0xd   : > { %s145_s14 = scalar_lea.vmem %s450_s0, %s356_s11  ;;  %v378_v11 = vld [vmem:[%s148_s17] ss:$0 sm:$0xff]  ;;  %s152_s25 = scalar_lea.vmem %s452_s2, %s356_s11 }
   0xe   : > { %v222_v0 = vld [vmem:[%s145_s14] sm:$0xf] }
   0xf   : > { %v155_v1 = vld [vmem:[%s145_s14] sm:$0xf]  ;;  %v224_v2 = vunpack.c.l.b16 %v222_v0 }
  0x10   : > { %v160_v3 = vunpack.c.l.b16 %v155_v1 }
  0x11   : > { %v225_v4 = vpack.c.b16 %v224_v2, %v224_v2 }
  0x12   : > { %v161_v5 = vpack.c.b16 %v160_v3, %v160_v3 }
  0x13   : > { %228 = vrot.lane.b32.xlu0 %v225_v4, %s395_s18 }
  0x14   : > { %162 = vrot.lane.b32.xlu1 %v161_v5, %s396_s19 }
  0x1b   : > { %226 = vrot.lane.b32.xlu0 %v225_v4, %s397_s20 }
  0x23   : > { %261 = vrot.lane.b32.xlu0 %v225_v4, %s398_s21 }
  0x2b   : > { %197 = vrot.lane.b32.xlu0 %v161_v5, %s399_s22 }
  0x85   : > { %v229_v6 = vpop.permute.xlu0 %228 }
  0x86   : > { %v163_v7 = vpop.permute.xlu1 %162  ;;  %v234_v9 = vsel %vm164_vm0, %v229_v6, 0 }
  0x87   : > { %v169_v8 = vsel %vm164_vm0, %v163_v7, 0  ;;  %243 = vmatpush.bf16.xpose.msra.mxu2 %v234_v9 }
  0x88   : > { %178 = vmatpush.bf16.xpose.msra.mxu0 %v169_v8 }
  0x8d   : > { %v227_v10 = vpop.permute.xlu0 %226 }
  0x8e   : > { %360 = vmatmul.msk.bf16.vlgmr.msra.gmra.mxu2 %vm164_vm0, %v227_v10 }
  0x8f   : > { %358 = vmatmul.msk.bf16.vlgmr.msra.gmra.mxu0 %vm164_vm0, %v155_v1 }
  0x95   : > { %v262_v30 = vpop.permute.xlu0 %261 }
  0x96   : > { %v267_v31 = vsel %vm202_vm2, %v262_v30, 0 }
  0x97   : > { %276 = vmatpush.bf16.msra.mxu3 %v267_v31 }
  0x9d   : > { %v198_v32 = vpop.permute.xlu0 %197 }
  0x9e   : > { %v204_v33 = vsel %vm202_vm2, %v198_v32, 0 }
  0x9f   : > { %213 = vmatpush.bf16.msra.mxu1 %v204_v33 }
 0x10c   : > { %v180_v12 = vpop.f32.mrf.mxu0 }
 0x10d   : > { %v181_v13 = vadd.f32 %v378_v11, %v180_v12 }
 0x10f   : > { %v185_v14 = vsel %vm184_vm1, %v181_v13, -inf }
 0x110   : > { %186 = vmax.xlane.f32.xlu2 %v185_v14 }
 0x111   : > { %v245_v15 = vpop.f32.mrf.mxu2 }
 0x112   : > { %v246_v16 = vadd.f32 %v378_v11, %v245_v15 }
 0x114   : > { %v182_v17 = vpop.f32.mrf.mxu0  ;;  %v249_v18 = vsel %vm184_vm1, %v246_v16, -inf }
 0x115   : > { %250 = vmax.xlane.f32.xlu1 %v249_v18 }
 0x119   : > { %v247_v19 = vpop.f32.mrf.mxu2 }
 0x183   : > { %v187_v20 = vpop.xlane.xlu2 %186 }
 0x184   : > { %v188_v23 = vsub.f32 %v181_v13, %v187_v20 }
 0x186   : > { %v189_v25 = vmul.f32 1.442695, %v188_v23 }
 0x188   : > { %v251_v21 = vpop.xlane.xlu1 %250 }
 0x189   : > { %v252_v22 = vsub.f32 %v246_v16, %v251_v21 }
 0x18b   : > { %v253_v24 = vmul.f32 1.442695, %v252_v22 }
 0x18d   : > { %379 = vpow2.f32 %v253_v24 }
 0x18e   : > { %381 = vpow2.f32 %v189_v25 }
 0x193   : > { %v380_v26 = vpop.eup %379 }
 0x194   : > { %v255_v27 = vsel %vm184_vm1, %v380_v26, 0.0  ;;  %v382_v28 = vpop.eup %381 }
 0x195   : > { %256 = vadd.xlane.f32.xlu2 %v255_v27  ;;  %v191_v29 = vsel %vm184_vm1, %v382_v28, 0.0 }
 0x19d   : > { %192 = vadd.xlane.f32.xlu2 %v191_v29 }
 0x208   : > { %v257_v34 = vpop.xlane.xlu2 %256 }
 0x209   : > { %383 = vrcp.f32 %v257_v34 }
 0x20f   : > { %v384_v35 = vpop.eup %383 }
 0x210   : > { %v193_v36 = vpop.xlane.xlu2 %192  ;;  %v259_v37 = vmul.f32 %v384_v35, %v380_v26 }
 0x211   : > { %385 = vrcp.f32 %v193_v36 }
 0x212   : > { %v260_v38 = vpack.c.bf16 %v259_v37, %v259_v37 }
 0x214   : > { %361 = vmatmul.msk.bf16.vlgmr.msra.gmra.mxu3 %vm184_vm1, %v260_v38 }
 0x217   : > { %v386_v39 = vpop.eup %385 }
 0x218   : > { %v195_v40 = vmul.f32 %v386_v39, %v382_v28 }
 0x21a   : > { %v196_v41 = vpack.c.bf16 %v195_v40, %v195_v40 }
 0x21c   : > { %359 = vmatmul.msk.bf16.vlgmr.msra.gmra.mxu1 %vm184_vm1, %v196_v41 }
 0x297   : > { %v278_v42 = vpop.f32.mrf.mxu3 }
 0x298   : > { %v282_v43 = vpack.c.bf16 %v278_v42, %v278_v42 }
 0x299   : > { %v215_v44 = vpop.f32.mrf.mxu1 }
 0x29a   : > { %v219_v45 = vpack.c.bf16 %v215_v44, %v215_v44  ;;  %284 = vrot.lane.b32.xlu2 %v282_v43, %s400_s26 }
 0x29c   : > { %221 = vst.msk [vmem:[%s152_s25] sm:$0xf] %vm220_vm3, %v219_v45 }
 0x29f   : > { %v280_v46 = vpop.f32.mrf.mxu3 }
 0x2a1   : > { %v217_v47 = vpop.f32.mrf.mxu1 }
 0x2f4   : > { %v285_v48 = vpop.permute.xlu2 %284 }
 0x2f5   : > { %288 = vst.msk [vmem:[%s152_s25] sm:$0xf] %vm287_vm4, %v285_v48 }
 0x2f6 PF: > { %s12_s9 = sadd.s32 1, %s393_s9  }
 0x2f7   : > { %p9_p4 = scmp.ge.s32.totalorder %s12_s9, 4  }
 0x2f9   :  { %11 = sbr.rel (!%p9_p4) target bundleno = 1 (0x1), region = 61 }

// kernel: run.10
= control target key start
LH: loop header
LB: loop body
LE: loop exit
PB: predicated region body
PF: predicated region fallthrough
CT: control target
= control target key end

     0   :  { %vm19_vm0 = vcmask 785408   ;;  %v108_v1 = vmov 0.0   ;;  %vm47_vm1 = vcmask 261120   ;;  %vm83_vm2 = vcmask 781312   ;;  %s151_s1 = inlined_call_operand.vmem [shape: bf16[32,96], index: 1, kind: input, shape index: {}]   ;;  %s152_s2 = inlined_call_operand.vmem [shape: f32[1,96], index: 2, kind: input, shape index: {}]   ;;  %s153_s0 = inlined_call_operand.vmem [shape: bf16[16,32], index: 0, kind: input, shape index: {}]   ;;  %s154_s3 = inlined_call_operand.vmem [shape: bf16[16,96], index: 3, kind: output, shape index: {}]  }
   0x1   :  { %v105_v0 = vld [vmem:[%s151_s1 + $0x8] sm:$0xff]  ;;  %20 = vst.msk [vmem:[#allocation2] sm:$0xff] %vm19_vm0, %v108_v1  ;;  %v104_v2 = vld [vmem:[%s151_s1] sm:$0xff] }
   0x2   :  { %21 = vst.msk [vmem:[#allocation2 + $0x8] sm:$0xff] %vm19_vm0, %v108_v1  ;;  %57 = vmatpush.bf16.msra.mxu0 %v105_v0  ;;  %v103_v3 = vld [vmem:[%s153_s0] sm:$0xff] }
   0x3   :  { %v107_v8 = vld [vmem:[%s152_s2] ss:$0 sm:$0xff] }
   0x6   :  { %58 = vmatpush.bf16.msra.mxu0 %v104_v2 }
   0x8   :  { %v22_v4 = vld [vmem:[#allocation2] sm:$0xff] }
   0x9   :  { %102 = vmatmul.msk.bf16.vlgmr.msra.gmra.mxu0 %vm47_vm1, %v103_v3  ;;  %v23_v7 = vld [vmem:[#allocation2 + $0x8] sm:$0xff] }
  0x86   :  { %v60_v5 = vpop.f32.mrf.mxu0 }
  0x87   :  { %v65_v6 = vadd.f32 %v60_v5, %v22_v4 }
  0x89   :  { %68 = vst.msk [vmem:[#allocation2] sm:$0xff] %vm19_vm0, %v65_v6 }
  0x8e   :  { %v62_v9 = vpop.f32.mrf.mxu0 }
  0x8f   :  { %v66_v10 = vadd.f32 %v62_v9, %v23_v7 }
  0x90   :  { %v73_v11 = vld [vmem:[#allocation2] sm:$0xff] }
  0x91   :  { %v79_v12 = vadd.f32 %v107_v8, %v73_v11  ;;  %69 = vst.msk [vmem:[#allocation2 + $0x8] sm:$0xff] %vm19_vm0, %v66_v10 }
  0x93   :  { %v81_v13 = vpack.c.bf16 %v79_v12, %v79_v12 }
  0x95   :  { %84 = vst.msk [vmem:[%s154_s3] sm:$0xf] %vm83_vm2, %v81_v13 }
  0x98   :  { %v74_v14 = vld [vmem:[#allocation2 + $0x8] sm:$0xff] }
  0x99   :  { %v80_v15 = vadd.f32 %v107_v8, %v74_v14 }
  0x9b   :  { %v82_v16 = vpack.c.bf16 %v80_v15, %v80_v15 }
  0x9d   :  { %85 = vst.msk [vmem:[%s154_s3 + $0x4] sm:$0xf] %vm83_vm2, %v82_v16 }

// kernel: run.12
= control target key start
LH: loop header
LB: loop body
LE: loop exit
PB: predicated region body
PF: predicated region fallthrough
CT: control target
= control target key end

     0   :  { %vm28_vm0 = vcmask 261120   ;;  %v198_v1 = vmov 0.0   ;;  %v199_v22 = vmov 32.0   ;;  %vm160_vm6 = vcmask 257024   ;;  %s271_s1 = inlined_call_operand.vmem [shape: bf16[32,32], index: 1, kind: input, shape index: {}]   ;;  %s272_s0 = inlined_call_operand.vmem [shape: bf16[16,32], index: 0, kind: input, shape index: {}]   ;;  %s273_s2 = inlined_call_operand.vmem [shape: f32[1,32], index: 2, kind: input, shape index: {}]   ;;  %s274_s3 = inlined_call_operand.vmem [shape: bf16[16,32], index: 3, kind: input, shape index: {}]   ;;  %s275_s4 = inlined_call_operand.vmem [shape: f32[1,32], index: 4, kind: input, shape index: {}]   ;;  %s276_s5 = inlined_call_operand.vmem [shape: f32[1,32], index: 5, kind: input, shape index: {}]   ;;  %s277_s6 = inlined_call_operand.vmem [shape: bf16[16,32], index: 6, kind: output, shape index: {}]  }
   0x1   :  { %v182_v0 = vld [vmem:[%s271_s1 + $0x8] sm:$0xff]  ;;  %29 = vst.msk [vmem:[#allocation2] sm:$0xff] %vm28_vm0, %v198_v1  ;;  %v181_v2 = vld [vmem:[%s271_s1] sm:$0xff]  ;;  %192 = vrcp.f32 %v199_v22 }
   0x2   :  { %30 = vst.msk [vmem:[#allocation2 + $0x8] sm:$0xff] %vm28_vm0, %v198_v1  ;;  %66 = vmatpush.bf16.msra.mxu0 %v182_v0  ;;  %v180_v3 = vld [vmem:[%s272_s0] sm:$0xff] }
   0x3   :  { %v184_v8 = vld [vmem:[%s274_s3] sm:$0xff]  }
   0x4   :  { %v189_v9 = vld [vmem:[%s273_s2] ss:$0 sm:$0xff]  ;;  %v185_v12 = vunpack.c.l.bf16 %v184_v8  ;;  %v186_v17 = vunpack.c.h.bf16 %v184_v8 }
   0x5   :  { %v190_v53 = vld [vmem:[%s275_s4] ss:$0 sm:$0xff] }
   0x6   :  { %67 = vmatpush.bf16.msra.mxu0 %v181_v2  ;;  %v191_v56 = vld [vmem:[%s276_s5] ss:$0 sm:$0xff] }
   0x7   :  { %v193_v23 = vpop.eup %192 }
   0x8   :  { %v31_v4 = vld [vmem:[#allocation2] sm:$0xff]  ;;  %v102_v24 = vmul.f32 32.0, %v193_v23  ;;  %vm106_vm1 = vweird.f32 %v193_v23 }
   0x9   :  { %179 = vmatmul.msk.bf16.vlgmr.msra.gmra.mxu0 %vm28_vm0, %v180_v3  ;;  %v32_v7 = vld [vmem:[#allocation2 + $0x8] sm:$0xff] }
   0xa   :  { %v103_v25 = vsub.f32 1.0, %v102_v24 }
   0xc   :  { %v104_v26 = vmul.f32 %v193_v23, %v103_v25 }
   0xe   :  { %v105_v27 = vadd.f32 %v193_v23, %v104_v26 }
  0x10   :  { %v107_v28 = vsel %vm106_vm1, %v193_v23, %v105_v27 }
  0x86   :  { %v69_v5 = vpop.f32.mrf.mxu0 }
  0x87   :  { %v74_v6 = vadd.f32 %v69_v5, %v31_v4 }
  0x89   :  { %76 = vst.msk [vmem:[#allocation2] sm:$0xff] %vm28_vm0, %v74_v6 }
  0x8e   :  { %v71_v10 = vpop.f32.mrf.mxu0 }
  0x8f   :  { %v75_v11 = vadd.f32 %v71_v10, %v32_v7 }
  0x90   :  { %v81_v13 = vld [vmem:[#allocation2] sm:$0xff] }
  0x91   :  { %77 = vst.msk [vmem:[#allocation2 + $0x8] sm:$0xff] %vm28_vm0, %v75_v11  ;;  %v87_v14 = vadd.f32 %v189_v9, %v81_v13 }
  0x93   :  { %v93_v15 = vadd.f32 %v185_v12, %v87_v14 }
  0x95   :  { %v95_v16 = vsel %vm28_vm0, %v93_v15, 0.0 }
  0x96   :  { %96 = vadd.xlane.f32.xlu0 %v95_v16 }
  0x98   :  { %v82_v18 = vld [vmem:[#allocation2 + $0x8] sm:$0xff] }
  0x99   :  { %v88_v19 = vadd.f32 %v189_v9, %v82_v18 }
  0x9b   :  { %v94_v20 = vadd.f32 %v186_v17, %v88_v19 }
  0x9d   :  { %v98_v21 = vsel %vm28_vm0, %v94_v20, 0.0 }
  0x9e   :  { %99 = vadd.xlane.f32.xlu0 %v98_v21 }
 0x109   :  { %v97_v29 = vpop.xlane.xlu0 %96 }
 0x10a   :  { %v108_v30 = vmul.f32 %v107_v28, %v97_v29 }
 0x10c   :  { %v110_v31 = vsub.f32 %v93_v15, %v108_v30 }
 0x10e   :  { %v112_v32 = vmul.f32 %v110_v31, %v110_v31 }
 0x110   :  { %v114_v33 = vsel %vm28_vm0, %v112_v32, 0.0 }
 0x111   :  { %115 = vadd.xlane.f32.xlu1 %v114_v33  ;;  %v100_v34 = vpop.xlane.xlu0 %99 }
 0x112   :  { %v109_v35 = vmul.f32 %v107_v28, %v100_v34 }
 0x114   :  { %v111_v36 = vsub.f32 %v94_v20, %v109_v35 }
 0x116   :  { %v113_v37 = vmul.f32 %v111_v36, %v111_v36 }
 0x118   :  { %v117_v38 = vsel %vm28_vm0, %v113_v37, 0.0 }
 0x119   :  { %118 = vadd.xlane.f32.xlu1 %v117_v38 }
 0x184   :  { %v116_v39 = vpop.xlane.xlu1 %115 }
 0x185   :  { %v120_v40 = vmul.f32 %v116_v39, %v107_v28 }
 0x187   :  { %v122_v41 = vadd.f32 1e-12, %v120_v40 }
 0x189   :  { %194 = vrsqrt.f32 %v122_v41  ;;  %vm130_vm3 = vweird.f32 %v122_v41 }
 0x18c   :  { %v119_v42 = vpop.xlane.xlu1 %118 }
 0x18d   :  { %v121_v43 = vmul.f32 %v119_v42, %v107_v28 }
 0x18f   :  { %v195_v44 = vpop.eup %194  ;;  %v123_v45 = vadd.f32 1e-12, %v121_v43 }
 0x190   :  { %v125_v46 = vmul.f32 %v195_v44, %v122_v41  ;;  %vm131_vm2 = vweird.f32 %v195_v44 }
 0x191   :  { %196 = vrsqrt.f32 %v123_v45  ;;  %vm132_vm4 = vmor %vm130_vm3, %vm131_vm2  ;;  %vm140_vm7 = vweird.f32 %v123_v45 }
 0x192   :  { %v126_v47 = vmul.f32 %v195_v44, %v125_v46 }
 0x194   :  { %v127_v48 = vmul.f32 0.5, %v126_v47 }
 0x196   :  { %v128_v49 = vsub.f32 1.5, %v127_v48 }
 0x197   :  { %v197_v50 = vpop.eup %196 }
 0x198   :  { %v129_v51 = vmul.f32 %v195_v44, %v128_v49  ;;  %v135_v52 = vmul.f32 %v197_v50, %v123_v45  ;;  %vm141_vm5 = vweird.f32 %v197_v50 }
 0x199   :  { %vm142_vm8 = vmor %vm140_vm7, %vm141_vm5 }
 0x19a   :  { %v133_v54 = vsel %vm132_vm4, %v195_v44, %v129_v51  ;;  %v136_v55 = vmul.f32 %v197_v50, %v135_v52 }
 0x19b   :  { %v144_v57 = vmul.f32 %v133_v54, %v110_v31 }
 0x19c   :  { %v137_v58 = vmul.f32 0.5, %v136_v55 }
 0x19d   :  { %v150_v59 = vmul.f32 %v190_v53, %v144_v57 }
 0x19e   :  { %v138_v60 = vsub.f32 1.5, %v137_v58 }
 0x19f   :  { %v156_v61 = vadd.f32 %v191_v56, %v150_v59 }
 0x1a0   :  { %v139_v62 = vmul.f32 %v197_v50, %v138_v60 }
 0x1a1   :  { %v158_v63 = vpack.c.bf16 %v156_v61, %v156_v61 }
 0x1a2   :  { %v143_v0 = vsel %vm142_vm8, %v197_v50, %v139_v62 }
 0x1a3   :  { %161 = vst.msk [vmem:[%s277_s6] sm:$0xf] %vm160_vm6, %v158_v63  ;;  %v145_v1 = vmul.f32 %v143_v0, %v111_v36 }
 0x1a5   :  { %v151_v2 = vmul.f32 %v190_v53, %v145_v1 }
 0x1a7   :  { %v157_v3 = vadd.f32 %v191_v56, %v151_v2 }
 0x1a9   :  { %v159_v4 = vpack.c.bf16 %v157_v3, %v157_v3 }
 0x1ab   :  { %162 = vst.msk [vmem:[%s277_s6 + $0x4] sm:$0xf] %vm160_vm6, %v159_v4 }

// kernel: run.13
= control target key start
LH: loop header
LB: loop body
LE: loop exit
PB: predicated region body
PF: predicated region fallthrough
CT: control target
= control target key end

     0   :  { %vm54_vm0 = vcmask 261120   ;;  %vm149_vm9 = vcmask 523264   ;;  %v299_v55 = vmov 32.0   ;;  %vm236_vm15 = vcmask 257024   ;;  %s387_s1 = inlined_call_operand.vmem [shape: bf16[32,64], index: 1, kind: input, shape index: {}]   ;;  %s388_s2 = inlined_call_operand.vmem [shape: f32[1,64], index: 2, kind: input, shape index: {}]   ;;  %s389_s0 = inlined_call_operand.vmem [shape: bf16[16,32], index: 0, kind: input, shape index: {}]   ;;  %s390_s4 = inlined_call_operand.vmem [shape: f32[1,32], index: 4, kind: input, shape index: {}]   ;;  %s391_s3 = inlined_call_operand.vmem [shape: bf16[64,32], index: 3, kind: input, shape index: {}]   ;;  %s392_s5 = inlined_call_operand.vmem [shape: f32[1,32], index: 5, kind: input, shape index: {}]   ;;  %s393_s6 = inlined_call_operand.vmem [shape: f32[1,32], index: 6, kind: input, shape index: {}]   ;;  %s394_s7 = inlined_call_operand.vmem [shape: bf16[16,32], index: 7, kind: output, shape index: {}]  }
   0x1   :  { %v275_v0 = vld [vmem:[%s387_s1 + $0x8] sm:$0xff]  ;;  %v274_v1 = vld [vmem:[%s387_s1] sm:$0xff]  ;;  %v279_v3 = vld [vmem:[%s391_s3 + $0x18] sm:$0xff] }
   0x2   :  { %64 = vmatpush.bf16.msra.mxu0 %v275_v0  ;;  %v273_v2 = vld [vmem:[%s389_s0] sm:$0xff]  ;;  %157 = vmatpush.bf16.msra.mxu1 %v279_v3  ;;  %v278_v6 = vld [vmem:[%s391_s3 + $0x10] sm:$0xff]  ;;  %v277_v9 = vld [vmem:[%s391_s3 + $0x8] sm:$0xff] }
   0x3   :  { %v281_v4 = vld [vmem:[%s388_s2] ss:$0 sm:$0xff] }
   0x4   :  { %v276_v12 = vld [vmem:[%s391_s3] sm:$0xff] }
   0x5   :  { %v27_v43 = vld [vmem:[%s389_s0] sm:$0xff]  }
   0x6   :  { %65 = vmatpush.bf16.msra.mxu0 %v274_v1  ;;  %158 = vmatpush.bf16.msra.mxu1 %v278_v6  ;;  %v282_v44 = vld [vmem:[%s390_s4] ss:$0 sm:$0xff]  ;;  %v167_v45 = vunpack.c.l.bf16 %v27_v43  ;;  %v168_v50 = vunpack.c.h.bf16 %v27_v43 }
   0x9   :  { %255 = vmatmul.msk.bf16.vlgmr.msra.gmra.mxu0 %vm54_vm0, %v273_v2 }
   0xa   :  { %159 = vmatpush.bf16.msra.mxu1 %v277_v9 }
   0xe   :  { %160 = vmatpush.bf16.msra.mxu1 %v276_v12 }
  0x86   :  { %v67_v5 = vpop.f32.mrf.mxu0 }
  0x87   :  { %v68_v7 = vadd.f32 %v281_v4, %v67_v5 }
  0x89   :  { %v72_v8 = vmul.f32 -1.702, %v68_v7 }
  0x8b   :  { %v74_v10 = vmul.f32 1.442695, %v72_v8 }
  0x8d   :  { %285 = vpow2.f32 %v74_v10 }
  0x8e   :  { %v69_v11 = vpop.f32.mrf.mxu0 }
  0x8f   :  { %v70_v13 = vadd.f32 %v281_v4, %v69_v11 }
  0x91   :  { %v73_v14 = vmul.f32 -1.702, %v70_v13 }
  0x93   :  { %v286_v15 = vpop.eup %285  ;;  %v76_v16 = vmul.f32 1.442695, %v73_v14 }
  0x94   :  { %v78_v17 = vadd.f32 1.0, %v286_v15 }
  0x95   :  { %287 = vpow2.f32 %v76_v16 }
  0x96   :  { %289 = vrcp.f32 %v78_v17  ;;  %v91_v27 = vand.u32 2147483648, %v78_v17  ;;  %vm85_vm2 = vweird.f32 %v78_v17  ;;  %v89_v28 = vand.u32 2147483647, %v78_v17 }
  0x98   :  { %v92_v34 = vor.u32 1.1754944e-38, %v91_v27  ;;  %vm90_vm5 = vcmp.eq.f32.partialorder %v89_v28, 8.507059e+37 }
  0x9b   :  { %v288_v18 = vpop.eup %287 }
  0x9c   :  { %v290_v19 = vpop.eup %289  ;;  %v79_v20 = vadd.f32 1.0, %v288_v18 }
  0x9d   :  { %v81_v21 = vmul.f32 %v290_v19, %v78_v17  ;;  %vm86_vm1 = vweird.f32 %v290_v19 }
  0x9e   :  { %291 = vrcp.f32 %v79_v20  ;;  %vm87_vm3 = vmor %vm85_vm2, %vm86_vm1  ;;  %v106_v30 = vand.u32 2147483648, %v79_v20  ;;  %v104_v33 = vand.u32 2147483647, %v79_v20  ;;  %vm100_vm6 = vweird.f32 %v79_v20 }
  0x9f   :  { %v82_v22 = vsub.f32 1.0, %v81_v21  ;;  %293 = vrcp.f32 %v299_v55 }
  0xa0   :  { %v107_v37 = vor.u32 1.1754944e-38, %v106_v30  ;;  %vm105_vm8 = vcmp.eq.f32.partialorder %v104_v33, 8.507059e+37 }
  0xa1   :  { %v83_v23 = vmul.f32 %v290_v19, %v82_v22  ;;  %v283_v22 = vld [vmem:[%s392_s5] ss:$0 sm:$0xff] }
  0xa3   :  { %v84_v25 = vadd.f32 %v290_v19, %v83_v23 }
  0xa4   :  { %v292_v24 = vpop.eup %291 }
  0xa5   :  { %v96_v26 = vmul.f32 %v292_v24, %v79_v20  ;;  %v88_v31 = vsel %vm87_vm3, %v290_v19, %v84_v25  ;;  %vm101_vm4 = vweird.f32 %v292_v24  ;;  %v294_v56 = vpop.eup %293  ;;  %v284_v25 = vld [vmem:[%s393_s6] ss:$0 sm:$0xff] }
  0xa6   :  { %v93_v36 = vsel %vm90_vm5, %v92_v34, %v88_v31  ;;  %vm102_vm7 = vmor %vm100_vm6, %vm101_vm4  ;;  %v178_v57 = vmul.f32 32.0, %v294_v56  ;;  %vm182_vm10 = vweird.f32 %v294_v56 }
  0xa7   :  { %v97_v29 = vsub.f32 1.0, %v96_v26  ;;  %v110_v40 = vmul.f32 %v93_v36, %v68_v7 }
  0xa8   :  { %v179_v58 = vsub.f32 1.0, %v178_v57 }
  0xa9   :  { %v98_v32 = vmul.f32 %v292_v24, %v97_v29 }
  0xaa   :  { %v180_v59 = vmul.f32 %v294_v56, %v179_v58 }
  0xab   :  { %v99_v35 = vadd.f32 %v292_v24, %v98_v32 }
  0xac   :  { %v181_v60 = vadd.f32 %v294_v56, %v180_v59 }
  0xad   :  { %v103_v38 = vsel %vm102_vm7, %v292_v24, %v99_v35 }
  0xae   :  { %v108_v39 = vsel %vm105_vm8, %v107_v37, %v103_v38  ;;  %v183_v61 = vsel %vm182_vm10, %v294_v56, %v181_v60 }
  0xaf   :  { %v111_v41 = vmul.f32 %v108_v39, %v70_v13 }
  0xb1   :  { %v112_v42 = vpack.c.bf16 %v111_v41, %v110_v40 }
  0xb3   :  { %272 = vmatmul.msk.bf16.vlgmr.msra.gmra.mxu1 %vm149_vm9, %v112_v42 }
 0x130   :  { %v162_v46 = vpop.f32.mrf.mxu1 }
 0x131   :  { %v163_v47 = vadd.f32 %v282_v44, %v162_v46 }
 0x133   :  { %v169_v48 = vadd.f32 %v167_v45, %v163_v47 }
 0x135   :  { %v171_v49 = vsel %vm54_vm0, %v169_v48, 0.0 }
 0x136   :  { %172 = vadd.xlane.f32.xlu0 %v171_v49 }
 0x138   :  { %v164_v51 = vpop.f32.mrf.mxu1 }
 0x139   :  { %v165_v52 = vadd.f32 %v282_v44, %v164_v51 }
 0x13b   :  { %v170_v53 = vadd.f32 %v168_v50, %v165_v52 }
 0x13d   :  { %v174_v54 = vsel %vm54_vm0, %v170_v53, 0.0 }
 0x13e   :  { %175 = vadd.xlane.f32.xlu0 %v174_v54 }
 0x1a9   :  { %v173_v62 = vpop.xlane.xlu0 %172 }
 0x1aa   :  { %v184_v63 = vmul.f32 %v183_v61, %v173_v62 }
 0x1ac   :  { %v186_v0 = vsub.f32 %v169_v48, %v184_v63 }
 0x1ae   :  { %v188_v1 = vmul.f32 %v186_v0, %v186_v0 }
 0x1b0   :  { %v190_v2 = vsel %vm54_vm0, %v188_v1, 0.0 }
 0x1b1   :  { %191 = vadd.xlane.f32.xlu1 %v190_v2  ;;  %v176_v3 = vpop.xlane.xlu0 %175 }
 0x1b2   :  { %v185_v4 = vmul.f32 %v183_v61, %v176_v3 }
 0x1b4   :  { %v187_v5 = vsub.f32 %v170_v53, %v185_v4 }
 0x1b6   :  { %v189_v6 = vmul.f32 %v187_v5, %v187_v5 }
 0x1b8   :  { %v193_v7 = vsel %vm54_vm0, %v189_v6, 0.0 }
 0x1b9   :  { %194 = vadd.xlane.f32.xlu1 %v193_v7 }
 0x224   :  { %v192_v8 = vpop.xlane.xlu1 %191 }
 0x225   :  { %v196_v9 = vmul.f32 %v192_v8, %v183_v61 }
 0x227   :  { %v198_v10 = vadd.f32 1e-12, %v196_v9 }
 0x229   :  { %295 = vrsqrt.f32 %v198_v10  ;;  %vm206_vm12 = vweird.f32 %v198_v10 }
 0x22c   :  { %v195_v11 = vpop.xlane.xlu1 %194 }
 0x22d   :  { %v197_v12 = vmul.f32 %v195_v11, %v183_v61 }
 0x22f   :  { %v296_v13 = vpop.eup %295  ;;  %v199_v14 = vadd.f32 1e-12, %v197_v12 }
 0x230   :  { %v201_v15 = vmul.f32 %v296_v13, %v198_v10  ;;  %vm207_vm11 = vweird.f32 %v296_v13 }
 0x231   :  { %297 = vrsqrt.f32 %v199_v14  ;;  %vm208_vm13 = vmor %vm206_vm12, %vm207_vm11  ;;  %vm216_vm0 = vweird.f32 %v199_v14 }
 0x232   :  { %v202_v16 = vmul.f32 %v296_v13, %v201_v15 }
 0x234   :  { %v203_v17 = vmul.f32 0.5, %v202_v16 }
 0x236   :  { %v204_v18 = vsub.f32 1.5, %v203_v17 }
 0x237   :  { %v298_v19 = vpop.eup %297 }
 0x238   :  { %v205_v20 = vmul.f32 %v296_v13, %v204_v18  ;;  %v211_v21 = vmul.f32 %v298_v19, %v199_v14  ;;  %vm217_vm14 = vweird.f32 %v298_v19 }
 0x239   :  { %vm218_vm1 = vmor %vm216_vm0, %vm217_vm14 }
 0x23a   :  { %v209_v23 = vsel %vm208_vm13, %v296_v13, %v205_v20  ;;  %v212_v24 = vmul.f32 %v298_v19, %v211_v21 }
 0x23b   :  { %v220_v26 = vmul.f32 %v209_v23, %v186_v0 }
 0x23c   :  { %v213_v27 = vmul.f32 0.5, %v212_v24 }
 0x23d   :  { %v226_v28 = vmul.f32 %v283_v22, %v220_v26 }
 0x23e   :  { %v214_v29 = vsub.f32 1.5, %v213_v27 }
 0x23f   :  { %v232_v30 = vadd.f32 %v284_v25, %v226_v28 }
 0x240   :  { %v215_v31 = vmul.f32 %v298_v19, %v214_v29 }
 0x241   :  { %v234_v32 = vpack.c.bf16 %v232_v30, %v232_v30 }
 0x242   :  { %v219_v33 = vsel %vm218_vm1, %v298_v19, %v215_v31 }
 0x243   :  { %237 = vst.msk [vmem:[%s394_s7] sm:$0xf] %vm236_vm15, %v234_v32  ;;  %v221_v34 = vmul.f32 %v219_v33, %v187_v5 }
 0x245   :  { %v227_v35 = vmul.f32 %v283_v22, %v221_v34 }
 0x247   :  { %v233_v36 = vadd.f32 %v284_v25, %v227_v35 }
 0x249   :  { %v235_v37 = vpack.c.bf16 %v233_v36, %v233_v36 }
 0x24b   :  { %238 = vst.msk [vmem:[%s394_s7 + $0x4] sm:$0xf] %vm236_vm15, %v235_v37 }

</bundles_post_ra>
